<compile_context>
chip_gen: v7x
topology: tpu7x:2x2x1
jax: 0.10.0
libtpu: 0.0.40
codegen_flags: <defaults>
</compile_context>

<pallas_src>
import math

import jax
import jax.numpy as jnp
import numpy as np
from jax import lax
from jax.experimental import pallas as pl
from jax.experimental.pallas import tpu as pltpu

# Module-consistent dimensions (real module: d_model=512, heads=8, middle=2048;
# scaled down for the synthetic run).
D_MODEL = 32
HEADS = 4
D_K = D_MODEL // HEADS        # 8
N_CHUNK = D_MODEL // D_K      # lane-chunks per row (== HEADS)
MIDDLE = 64
EPS = 1e-5


# ------------------------------ fused kernel ------------------------------

def _decoder_layer_kernel(emb_ref, enc_ref, tmask_ref,
                          wqkv_ref, bqkv_ref, wo1_ref, bo1_ref,
                          wq2_ref, bq2_ref, wkv2_ref, bkv2_ref, wo2_ref, bo2_ref,
                          g_ref, beta_ref,
                          w1_ref, b1_ref, w2_ref, b2_ref,
                          out_ref):
    f32 = jnp.float32
    sq = emb_ref.shape[1]          # decoder length
    sk = enc_ref.shape[1]          # encoder length

    x = emb_ref[0]                 # (sq, D)
    enc = enc_ref[0]               # (sk, D)
    tm = tmask_ref[0]              # (sq, sq) float, 0 == masked
    gamma = g_ref[...]             # (1, D)
    beta = beta_ref[...]           # (1, D)

    def layer_norm(v):
        mu = jnp.mean(v, axis=-1, keepdims=True)
        var = jnp.mean(jnp.square(v - mu), axis=-1, keepdims=True)  # biased (torch)
        return (v - mu) * lax.rsqrt(var + EPS) * gamma + beta

    def head_perm(s_len):
        # P[i, j] = 1  iff  j == (i % N_CHUNK) * s_len + i // N_CHUNK
        # (rewritten without integer division:  N_CHUNK*j == (i & (N_CHUNK-1)) *
        #  (N_CHUNK*s_len - 1) + i).  Maps chunk-major rows to head-stacked rows.
        n = HEADS * s_len
        ii = lax.broadcasted_iota(jnp.int32, (n, n), 0)
        jj = lax.broadcasted_iota(jnp.int32, (n, n), 1)
        rhs = (ii & (N_CHUNK - 1)) * (N_CHUNK * s_len - 1) + ii
        return (N_CHUNK * jj == rhs).astype(f32)

    def stack_heads(m, perm):
        # torch raw view: (s, D) -> (HEADS * s, D_K);  row h*s + q of the result
        # is flat elements [ (h*s+q)*D_K , ...+D_K ) of m.
        chunks = [m[:, c * D_K:(c + 1) * D_K] for c in range(N_CHUNK)]
        cm = jnp.concatenate(chunks, axis=0)               # chunk-major (H*s, D_K)
        return jnp.dot(perm, cm, preferred_element_type=f32)

    def attention(q2d, k2d, v2d, perm_qm, perm_km, tgt_mask):
        s_q, s_k = q2d.shape[0], k2d.shape[0]
        nq, nk = HEADS * s_q, HEADS * s_k
        qs = stack_heads(q2d, perm_qm)                     # (nq, D_K), scale folded
        ks = stack_heads(k2d, perm_km)                     # (nk, D_K)
        vs = stack_heads(v2d, perm_km)                     # (nk, D_K)
        # one MXU pass for all heads' scores
        s = lax.dot_general(qs, ks, (((1,), (1,)), ((), ())),
                            preferred_element_type=f32)    # (nq, nk)
        if tgt_mask is not None:
            # tile the (s_q, s_k) mask over heads: T[i, j] = mask[i % s_q, j % s_k]
            a_l = (lax.broadcasted_iota(jnp.int32, (nq, s_q), 1) ==
                   (lax.broadcasted_iota(jnp.int32, (nq, s_q), 0) & (s_q - 1))
                   ).astype(f32)
            a_r = (lax.broadcasted_iota(jnp.int32, (s_k, nk), 0) ==
                   (lax.broadcasted_iota(jnp.int32, (s_k, nk), 1) & (s_k - 1))
                   ).astype(f32)
            tiled = jnp.dot(jnp.dot(a_l, tgt_mask, preferred_element_type=f32),
                            a_r, preferred_element_type=f32)
            s = jnp.where(tiled == 0.0, f32(-1e9), s)      # masked_fill(mask == 0)
        # each stacked query row only attends to its own head's key block
        ii = lax.broadcasted_iota(jnp.int32, (nq, nk), 0)
        jj = lax.broadcasted_iota(jnp.int32, (nq, nk), 1)
        same_head = ((ii & ~(s_q - 1)) * s_k) == ((jj & ~(s_k - 1)) * s_q)
        s = jnp.where(same_head, s, f32(-1e30))
        s = s - jnp.max(s, axis=-1, keepdims=True)
        e = jnp.exp(s)
        w = e * pl.reciprocal(jnp.sum(e, axis=-1, keepdims=True), approx=True)
        return jnp.dot(w, vs, preferred_element_type=f32)  # head-stacked (nq, D_K)

    def merge_project(ctx, wo, bo, s_q):
        # context.transpose(1,2).flatten(2) @ Wo + bo  ==  sum_h ctx_h @ Wo_h + bo
        y = bo
        for h in range(HEADS):
            y = y + jnp.dot(ctx[h * s_q:(h + 1) * s_q, :],
                            wo[h * D_K:(h + 1) * D_K, :],
                            preferred_element_type=f32)
        return y

    perm_q = head_perm(sq)
    perm_k = head_perm(sk) if sk != sq else perm_q

    # ---- self attention + residual + LayerNorm ----
    qkv = jnp.dot(x, wqkv_ref[...], preferred_element_type=f32) + bqkv_ref[...]
    ctx1 = attention(qkv[:, :D_MODEL], qkv[:, D_MODEL:2 * D_MODEL],
                     qkv[:, 2 * D_MODEL:], perm_q, perm_q, tm)
    query = layer_norm(merge_project(ctx1, wo1_ref[...], bo1_ref[...], sq) + x)

    # ---- src attention (no mask) + residual + LayerNorm ----
    q2 = jnp.dot(query, wq2_ref[...], preferred_element_type=f32) + bq2_ref[...]
    kv2 = jnp.dot(enc, wkv2_ref[...], preferred_element_type=f32) + bkv2_ref[...]
    ctx2 = attention(q2, kv2[:, :D_MODEL], kv2[:, D_MODEL:], perm_q, perm_k, None)
    inter = layer_norm(merge_project(ctx2, wo2_ref[...], bo2_ref[...], sq) + query)

    # ---- feed-forward + residual + LayerNorm ----
    h1 = jnp.maximum(
        jnp.dot(inter, w1_ref[...], preferred_element_type=f32) + b1_ref[...], 0.0)
    ff = jnp.dot(h1, w2_ref[...], preferred_element_type=f32) + b2_ref[...]
    out_ref[0] = layer_norm(ff + inter).astype(out_ref.dtype)


# --------------------------- fused decoder layer ---------------------------

def decoder_layer(embeddings, encoded, target_mask, params):
    # Eval-mode forward: every nn.Dropout is the identity.
    B, Sq, D = embeddings.shape
    Sk = encoded.shape[1]
    assert D == D_MODEL
    # the in-kernel bitmask index math assumes power-of-two sequence lengths
    assert Sq & (Sq - 1) == 0 and Sk & (Sk - 1) == 0

    scale = 1.0 / math.sqrt(D_K)
    ps, pc, pf = params["self_mha"], params["src_mha"], params["ffn"]

    # Fold 1/sqrt(d_k) into the Q projections; concat QKV / KV weights so each
    # input-side projection is a single matmul.
    w_self_qkv = jnp.concatenate([ps["wq"] * scale, ps["wk"], ps["wv"]], axis=1)
    b_self_qkv = jnp.concatenate([ps["bq"] * scale, ps["bk"], ps["bv"]]).reshape(1, 3 * D)
    w_src_kv = jnp.concatenate([pc["wk"], pc["wv"]], axis=1)
    b_src_kv = jnp.concatenate([pc["bk"], pc["bv"]]).reshape(1, 2 * D)
    wq_src = pc["wq"] * scale
    bq_src = (pc["bq"] * scale).reshape(1, D)
    gamma = params["ln_g"].reshape(1, D)
    beta = params["ln_b"].reshape(1, D)
    tmask = target_mask.reshape(B, Sq, Sq)   # drop the broadcast head dim

    def wspec(shape):
        return pl.BlockSpec(shape, lambda b: (0, 0))

    return pl.pallas_call(
        _decoder_layer_kernel,
        out_shape=jax.ShapeDtypeStruct((B, Sq, D), jnp.float32),
        grid=(B,),
        in_specs=[
            pl.BlockSpec((1, Sq, D), lambda b: (b, 0, 0)),    # embeddings
            pl.BlockSpec((1, Sk, D), lambda b: (b, 0, 0)),    # encoded
            pl.BlockSpec((1, Sq, Sq), lambda b: (b, 0, 0)),   # target mask
            wspec((D, 3 * D)), wspec((1, 3 * D)),             # self QKV
            wspec((D, D)), wspec((1, D)),                     # self out proj
            wspec((D, D)), wspec((1, D)),                     # src Q
            wspec((D, 2 * D)), wspec((1, 2 * D)),             # src KV
            wspec((D, D)), wspec((1, D)),                     # src out proj
            wspec((1, D)), wspec((1, D)),                     # LayerNorm gamma/beta
            wspec((D, MIDDLE)), wspec((1, MIDDLE)),           # fc1
            wspec((MIDDLE, D)), wspec((1, D)),                # fc2
        ],
        out_specs=pl.BlockSpec((1, Sq, D), lambda b: (b, 0, 0)),
        compiler_params=pltpu.CompilerParams(
            dimension_semantics=("parallel",)),               # 2 TCs on v7x
    )(embeddings, encoded, tmask,
      w_self_qkv, b_self_qkv, ps["wo"], ps["bo"].reshape(1, D),
      wq_src, bq_src, w_src_kv, b_src_kv, pc["wo"], pc["bo"].reshape(1, D),
      gamma, beta,
      pf["w1"], pf["b1"].reshape(1, MIDDLE), pf["w2"], pf["b2"].reshape(1, D))


# --------------------------- params & reference ---------------------------

def init_params(key):
    ks = iter(jax.random.split(key, 32))

    def dense(din, dout):
        w = 0.05 * jax.random.normal(next(ks), (din, dout), jnp.float32)
        b = 0.05 * jax.random.normal(next(ks), (dout,), jnp.float32)
        return w, b

    def mha_p():
        p = {}
        for name in ("q", "k", "v", "o"):
            w, b = dense(D_MODEL, D_MODEL)
            p["w" + name], p["b" + name] = w, b
        return p

    self_mha = mha_p()
    src_mha = mha_p()
    w1, b1 = dense(D_MODEL, MIDDLE)
    w2, b2 = dense(MIDDLE, D_MODEL)
    return {
        "self_mha": self_mha,
        "src_mha": src_mha,
        "ffn": {"w1": w1, "b1": b1, "w2": w2, "b2": b2},
        "ln_g": 1.0 + 0.05 * jax.random.normal(next(ks), (D_MODEL,), jnp.float32),
        "ln_b": 0.05 * jax.random.normal(next(ks), (D_MODEL,), jnp.float32),
    }


def reference_decoder_layer(embeddings, encoded, target_mask, params):
    """Pure-JAX mirror of the PyTorch forward (eval mode), for verification."""
    def ln(x):
        mu = jnp.mean(x, -1, keepdims=True)
        var = jnp.mean((x - mu) ** 2, -1, keepdims=True)
        return (x - mu) / jnp.sqrt(var + EPS) * params["ln_g"] + params["ln_b"]

    def mha(xq, xkv, mask, p):
        B, Sq, D = xq.shape
        q = (xq @ p["wq"] + p["bq"]).reshape(B, HEADS, -1, D_K)
        k = (xkv @ p["wk"] + p["bk"]).reshape(B, HEADS, -1, D_K)
        v = (xkv @ p["wv"] + p["bv"]).reshape(B, HEADS, -1, D_K)
        s = jnp.einsum("bhqd,bhkd->bhqk", q, k) / math.sqrt(D_K)
        if mask is not None:
            s = jnp.where(mask == 0.0, -1e9, s)
        w = jax.nn.softmax(s, axis=-1)
        ctx = jnp.einsum("bhqk,bhkd->bhqd", w, v)
        ctx = jnp.transpose(ctx, (0, 2, 1, 3)).reshape(B, Sq, D)
        return ctx @ p["wo"] + p["bo"]

    def ffn(x, p):
        return jax.nn.relu(x @ p["w1"] + p["b1"]) @ p["w2"] + p["b2"]

    q = mha(embeddings, embeddings, target_mask, params["self_mha"])
    query = ln(q + embeddings)
    inter = mha(query, encoded, None, params["src_mha"])
    inter = ln(inter + query)
    ff = ffn(inter, params["ffn"])
    return ln(ff + inter)


# ----------------------------------- main -----------------------------------

if __name__ == "__main__":
    B, S = 2, 8
    key = jax.random.PRNGKey(0)
    kp, ke, kc = jax.random.split(key, 3)
    params = init_params(kp)

    embeddings = jax.random.normal(ke, (B, S, D_MODEL), jnp.float32)
    encoded = jax.random.normal(kc, (B, S, D_MODEL), jnp.float32)
    # causal target mask, (B, 1, S, S), 1 = keep, 0 = masked (matches mask==0 fill)
    target_mask = jnp.broadcast_to(
        jnp.tril(jnp.ones((S, S), jnp.float32))[None, None], (B, 1, S, S)
    )

    out = jax.jit(decoder_layer)(embeddings, encoded, target_mask, params)
    out = jax.block_until_ready(out)

    ref = reference_decoder_layer(embeddings, encoded, target_mask, params)
    np.testing.assert_allclose(np.asarray(out), np.asarray(ref), rtol=1e-2, atol=1e-2)

    print("KERNEL_OK")
</pallas_src>

<mosaic_0001>
module attributes {stable_mosaic.version = 11 : i64} {
  func.func @_decoder_layer_kernel(%arg0: i32, %arg1: memref<1x8x32xf32, #tpu.memory_space<vmem>>, %arg2: memref<1x8x32xf32, #tpu.memory_space<vmem>>, %arg3: memref<1x8x8xf32, #tpu.memory_space<vmem>>, %arg4: memref<32x96xf32, #tpu.memory_space<vmem>>, %arg5: memref<1x96xf32, #tpu.memory_space<vmem>>, %arg6: memref<32x32xf32, #tpu.memory_space<vmem>>, %arg7: memref<1x32xf32, #tpu.memory_space<vmem>>, %arg8: memref<32x32xf32, #tpu.memory_space<vmem>>, %arg9: memref<1x32xf32, #tpu.memory_space<vmem>>, %arg10: memref<32x64xf32, #tpu.memory_space<vmem>>, %arg11: memref<1x64xf32, #tpu.memory_space<vmem>>, %arg12: memref<32x32xf32, #tpu.memory_space<vmem>>, %arg13: memref<1x32xf32, #tpu.memory_space<vmem>>, %arg14: memref<1x32xf32, #tpu.memory_space<vmem>>, %arg15: memref<1x32xf32, #tpu.memory_space<vmem>>, %arg16: memref<32x64xf32, #tpu.memory_space<vmem>>, %arg17: memref<1x64xf32, #tpu.memory_space<vmem>>, %arg18: memref<64x32xf32, #tpu.memory_space<vmem>>, %arg19: memref<1x32xf32, #tpu.memory_space<vmem>>, %arg20: memref<1x8x32xf32, #tpu.memory_space<vmem>>) attributes {dimension_semantics = [#tpu.dimension_semantics<parallel>], iteration_bounds = array<i64: 2>, scalar_prefetch = 0 : i64, scratch_operands = 0 : i64, tpu.core_type = #tpu.core_type<tc>, window_params = [{transform_indices = @transform_0, window_bounds = array<i64: 1, 8, 32>}, {transform_indices = @transform_1, window_bounds = array<i64: 1, 8, 32>}, {transform_indices = @transform_2, window_bounds = array<i64: 1, 8, 8>}, {pipeline_mode = #tpu.pipeline_mode<synchronous>, transform_indices = @transform_3, window_bounds = array<i64: 32, 96>}, {pipeline_mode = #tpu.pipeline_mode<synchronous>, transform_indices = @transform_4, window_bounds = array<i64: 1, 96>}, {pipeline_mode = #tpu.pipeline_mode<synchronous>, transform_indices = @transform_5, window_bounds = array<i64: 32, 32>}, {pipeline_mode = #tpu.pipeline_mode<synchronous>, transform_indices = @transform_6, window_bounds = array<i64: 1, 32>}, {pipeline_mode = #tpu.pipeline_mode<synchronous>, transform_indices = @transform_7, window_bounds = array<i64: 32, 32>}, {pipeline_mode = #tpu.pipeline_mode<synchronous>, transform_indices = @transform_8, window_bounds = array<i64: 1, 32>}, {pipeline_mode = #tpu.pipeline_mode<synchronous>, transform_indices = @transform_9, window_bounds = array<i64: 32, 64>}, {pipeline_mode = #tpu.pipeline_mode<synchronous>, transform_indices = @transform_10, window_bounds = array<i64: 1, 64>}, {pipeline_mode = #tpu.pipeline_mode<synchronous>, transform_indices = @transform_11, window_bounds = array<i64: 32, 32>}, {pipeline_mode = #tpu.pipeline_mode<synchronous>, transform_indices = @transform_12, window_bounds = array<i64: 1, 32>}, {pipeline_mode = #tpu.pipeline_mode<synchronous>, transform_indices = @transform_13, window_bounds = array<i64: 1, 32>}, {pipeline_mode = #tpu.pipeline_mode<synchronous>, transform_indices = @transform_14, window_bounds = array<i64: 1, 32>}, {pipeline_mode = #tpu.pipeline_mode<synchronous>, transform_indices = @transform_15, window_bounds = array<i64: 32, 64>}, {pipeline_mode = #tpu.pipeline_mode<synchronous>, transform_indices = @transform_16, window_bounds = array<i64: 1, 64>}, {pipeline_mode = #tpu.pipeline_mode<synchronous>, transform_indices = @transform_17, window_bounds = array<i64: 64, 32>}, {pipeline_mode = #tpu.pipeline_mode<synchronous>, transform_indices = @transform_18, window_bounds = array<i64: 1, 32>}, {transform_indices = @transform_19, window_bounds = array<i64: 1, 8, 32>}]} {
    %c0 = arith.constant 0 : index
    %c0_0 = arith.constant 0 : index
    %c0_1 = arith.constant 0 : index
    %0 = vector.load %arg1[%c0, %c0_0, %c0_1] : memref<1x8x32xf32, #tpu.memory_space<vmem>>, vector<1x8x32xf32>
    %1 = vector.shape_cast %0 : vector<1x8x32xf32> to vector<8x32xf32>
    %c0_2 = arith.constant 0 : index
    %c0_3 = arith.constant 0 : index
    %c0_4 = arith.constant 0 : index
    %2 = vector.load %arg2[%c0_2, %c0_3, %c0_4] : memref<1x8x32xf32, #tpu.memory_space<vmem>>, vector<1x8x32xf32>
    %3 = vector.shape_cast %2 : vector<1x8x32xf32> to vector<8x32xf32>
    %c0_5 = arith.constant 0 : index
    %c0_6 = arith.constant 0 : index
    %c0_7 = arith.constant 0 : index
    %4 = vector.load %arg3[%c0_5, %c0_6, %c0_7] : memref<1x8x8xf32, #tpu.memory_space<vmem>>, vector<1x8x8xf32>
    %5 = vector.shape_cast %4 : vector<1x8x8xf32> to vector<8x8xf32>
    %c0_8 = arith.constant 0 : index
    %c0_9 = arith.constant 0 : index
    %6 = vector.load %arg14[%c0_8, %c0_9] : memref<1x32xf32, #tpu.memory_space<vmem>>, vector<1x32xf32>
    %c0_10 = arith.constant 0 : index
    %c0_11 = arith.constant 0 : index
    %7 = vector.load %arg15[%c0_10, %c0_11] : memref<1x32xf32, #tpu.memory_space<vmem>>, vector<1x32xf32>
    %8 = tpu.iota {dimensions = array<i32: 0>} : vector<32x32xi32>
    %9 = tpu.iota {dimensions = array<i32: 1>} : vector<32x32xi32>
    %c3_i32 = arith.constant 3 : i32
    %10 = vector.broadcast %c3_i32 : i32 to vector<32x32xi32>
    %11 = arith.andi %8, %10 : vector<32x32xi32>
    %c31_i32 = arith.constant 31 : i32
    %12 = vector.broadcast %c31_i32 : i32 to vector<32x32xi32>
    %13 = arith.muli %11, %12 : vector<32x32xi32>
    %14 = arith.addi %13, %8 : vector<32x32xi32>
    %c4_i32 = arith.constant 4 : i32
    %15 = vector.broadcast %c4_i32 : i32 to vector<32x32xi32>
    %16 = arith.muli %15, %9 : vector<32x32xi32>
    %17 = arith.cmpi eq, %16, %14 : vector<32x32xi32>
    %18 = arith.extui %17 : vector<32x32xi1> to vector<32x32xi32>
    %19 = arith.sitofp %18 : vector<32x32xi32> to vector<32x32xf32>
    %c0_12 = arith.constant 0 : index
    %c0_13 = arith.constant 0 : index
    %20 = vector.load %arg4[%c0_12, %c0_13] : memref<32x96xf32, #tpu.memory_space<vmem>>, vector<32x96xf32>
    %cst = arith.constant dense<0.000000e+00> : vector<8x96xf32>
    %21 = tpu.matmul %1, %20, %cst {dimension_numbers = #tpu.dot_dimension_numbers<[1], [0], [0], [1], [0, 0, 1, 1], [], []>} : vector<8x32xf32>, vector<32x96xf32>, vector<8x96xf32> -> vector<8x96xf32>
    %c0_14 = arith.constant 0 : index
    %c0_15 = arith.constant 0 : index
    %22 = vector.load %arg5[%c0_14, %c0_15] : memref<1x96xf32, #tpu.memory_space<vmem>>, vector<1x96xf32>
    %23 = vector.broadcast %22 : vector<1x96xf32> to vector<8x96xf32>
    %24 = arith.addf %21, %23 : vector<8x96xf32>
    %25 = vector.extract_strided_slice %24 {offsets = [0, 0], sizes = [8, 32], strides = [1, 1]} : vector<8x96xf32> to vector<8x32xf32>
    %26 = vector.extract_strided_slice %24 {offsets = [0, 32], sizes = [8, 32], strides = [1, 1]} : vector<8x96xf32> to vector<8x32xf32>
    %27 = vector.extract_strided_slice %24 {offsets = [0, 64], sizes = [8, 32], strides = [1, 1]} : vector<8x96xf32> to vector<8x32xf32>
    %28 = vector.extract_strided_slice %25 {offsets = [0, 0], sizes = [8, 8], strides = [1, 1]} : vector<8x32xf32> to vector<8x8xf32>
    %29 = vector.extract_strided_slice %25 {offsets = [0, 8], sizes = [8, 8], strides = [1, 1]} : vector<8x32xf32> to vector<8x8xf32>
    %30 = vector.extract_strided_slice %25 {offsets = [0, 16], sizes = [8, 8], strides = [1, 1]} : vector<8x32xf32> to vector<8x8xf32>
    %31 = vector.extract_strided_slice %25 {offsets = [0, 24], sizes = [8, 8], strides = [1, 1]} : vector<8x32xf32> to vector<8x8xf32>
    %32 = tpu.concatenate %28, %29, %30, %31 in 0 : vector<8x8xf32>, vector<8x8xf32>, vector<8x8xf32>, vector<8x8xf32> -> vector<32x8xf32>
    %cst_16 = arith.constant dense<0.000000e+00> : vector<32x8xf32>
    %33 = tpu.matmul %19, %32, %cst_16 {dimension_numbers = #tpu.dot_dimension_numbers<[1], [0], [0], [1], [0, 0, 1, 1], [], []>} : vector<32x32xf32>, vector<32x8xf32>, vector<32x8xf32> -> vector<32x8xf32>
    %34 = vector.extract_strided_slice %26 {offsets = [0, 0], sizes = [8, 8], strides = [1, 1]} : vector<8x32xf32> to vector<8x8xf32>
    %35 = vector.extract_strided_slice %26 {offsets = [0, 8], sizes = [8, 8], strides = [1, 1]} : vector<8x32xf32> to vector<8x8xf32>
    %36 = vector.extract_strided_slice %26 {offsets = [0, 16], sizes = [8, 8], strides = [1, 1]} : vector<8x32xf32> to vector<8x8xf32>
    %37 = vector.extract_strided_slice %26 {offsets = [0, 24], sizes = [8, 8], strides = [1, 1]} : vector<8x32xf32> to vector<8x8xf32>
    %38 = tpu.concatenate %34, %35, %36, %37 in 0 : vector<8x8xf32>, vector<8x8xf32>, vector<8x8xf32>, vector<8x8xf32> -> vector<32x8xf32>
    %cst_17 = arith.constant dense<0.000000e+00> : vector<32x8xf32>
    %39 = tpu.matmul %19, %38, %cst_17 {dimension_numbers = #tpu.dot_dimension_numbers<[1], [0], [0], [1], [0, 0, 1, 1], [], []>} : vector<32x32xf32>, vector<32x8xf32>, vector<32x8xf32> -> vector<32x8xf32>
    %40 = vector.extract_strided_slice %27 {offsets = [0, 0], sizes = [8, 8], strides = [1, 1]} : vector<8x32xf32> to vector<8x8xf32>
    %41 = vector.extract_strided_slice %27 {offsets = [0, 8], sizes = [8, 8], strides = [1, 1]} : vector<8x32xf32> to vector<8x8xf32>
    %42 = vector.extract_strided_slice %27 {offsets = [0, 16], sizes = [8, 8], strides = [1, 1]} : vector<8x32xf32> to vector<8x8xf32>
    %43 = vector.extract_strided_slice %27 {offsets = [0, 24], sizes = [8, 8], strides = [1, 1]} : vector<8x32xf32> to vector<8x8xf32>
    %44 = tpu.concatenate %40, %41, %42, %43 in 0 : vector<8x8xf32>, vector<8x8xf32>, vector<8x8xf32>, vector<8x8xf32> -> vector<32x8xf32>
    %cst_18 = arith.constant dense<0.000000e+00> : vector<32x8xf32>
    %45 = tpu.matmul %19, %44, %cst_18 {dimension_numbers = #tpu.dot_dimension_numbers<[1], [0], [0], [1], [0, 0, 1, 1], [], []>} : vector<32x32xf32>, vector<32x8xf32>, vector<32x8xf32> -> vector<32x8xf32>
    %cst_19 = arith.constant dense<0.000000e+00> : vector<32x32xf32>
    %46 = tpu.matmul %33, %39, %cst_19 {dimension_numbers = #tpu.dot_dimension_numbers<[1], [1], [0], [0], [0, 0, 1, 0], [], []>} : vector<32x8xf32>, vector<32x8xf32>, vector<32x32xf32> -> vector<32x32xf32>
    %47 = tpu.iota {dimensions = array<i32: 1>} : vector<32x8xi32>
    %48 = tpu.iota {dimensions = array<i32: 0>} : vector<32x8xi32>
    %c7_i32 = arith.constant 7 : i32
    %49 = vector.broadcast %c7_i32 : i32 to vector<32x8xi32>
    %50 = arith.andi %48, %49 : vector<32x8xi32>
    %51 = arith.cmpi eq, %47, %50 : vector<32x8xi32>
    %52 = arith.extui %51 : vector<32x8xi1> to vector<32x8xi32>
    %53 = arith.sitofp %52 : vector<32x8xi32> to vector<32x8xf32>
    %54 = tpu.iota {dimensions = array<i32: 0>} : vector<8x32xi32>
    %55 = tpu.iota {dimensions = array<i32: 1>} : vector<8x32xi32>
    %c7_i32_20 = arith.constant 7 : i32
    %56 = vector.broadcast %c7_i32_20 : i32 to vector<8x32xi32>
    %57 = arith.andi %55, %56 : vector<8x32xi32>
    %58 = arith.cmpi eq, %54, %57 : vector<8x32xi32>
    %59 = arith.extui %58 : vector<8x32xi1> to vector<8x32xi32>
    %60 = arith.sitofp %59 : vector<8x32xi32> to vector<8x32xf32>
    %cst_21 = arith.constant dense<0.000000e+00> : vector<32x8xf32>
    %61 = tpu.matmul %53, %5, %cst_21 {dimension_numbers = #tpu.dot_dimension_numbers<[1], [0], [0], [1], [0, 0, 1, 1], [], []>} : vector<32x8xf32>, vector<8x8xf32>, vector<32x8xf32> -> vector<32x8xf32>
    %cst_22 = arith.constant dense<0.000000e+00> : vector<32x32xf32>
    %62 = tpu.matmul %61, %60, %cst_22 {dimension_numbers = #tpu.dot_dimension_numbers<[1], [0], [0], [1], [0, 0, 1, 1], [], []>} : vector<32x8xf32>, vector<8x32xf32>, vector<32x32xf32> -> vector<32x32xf32>
    %cst_23 = arith.constant 0.000000e+00 : f32
    %63 = vector.broadcast %cst_23 : f32 to vector<32x32xf32>
    %64 = arith.cmpf oeq, %62, %63 : vector<32x32xf32>
    %cst_24 = arith.constant -1.000000e+09 : f32
    %65 = vector.broadcast %cst_24 : f32 to vector<32x32xf32>
    %66 = arith.select %64, %65, %46 : vector<32x32xi1>, vector<32x32xf32>
    %67 = tpu.iota {dimensions = array<i32: 0>} : vector<32x32xi32>
    %68 = tpu.iota {dimensions = array<i32: 1>} : vector<32x32xi32>
    %c-8_i32 = arith.constant -8 : i32
    %69 = vector.broadcast %c-8_i32 : i32 to vector<32x32xi32>
    %70 = arith.andi %67, %69 : vector<32x32xi32>
    %c8_i32 = arith.constant 8 : i32
    %71 = vector.broadcast %c8_i32 : i32 to vector<32x32xi32>
    %72 = arith.muli %70, %71 : vector<32x32xi32>
    %c-8_i32_25 = arith.constant -8 : i32
    %73 = vector.broadcast %c-8_i32_25 : i32 to vector<32x32xi32>
    %74 = arith.andi %68, %73 : vector<32x32xi32>
    %c8_i32_26 = arith.constant 8 : i32
    %75 = vector.broadcast %c8_i32_26 : i32 to vector<32x32xi32>
    %76 = arith.muli %74, %75 : vector<32x32xi32>
    %77 = arith.cmpi eq, %72, %76 : vector<32x32xi32>
    %cst_27 = arith.constant -1.000000e+30 : f32
    %78 = vector.broadcast %cst_27 : f32 to vector<32x32xf32>
    %79 = arith.select %77, %66, %78 : vector<32x32xi1>, vector<32x32xf32>
    %cst_28 = arith.constant dense<0xFF800000> : vector<32xf32>
    %80 = vector.multi_reduction <maximumf>, %79, %cst_28 [1] : vector<32x32xf32> to vector<32xf32>
    %81 = vector.shape_cast %80 : vector<32xf32> to vector<32x1xf32>
    %82 = vector.broadcast %81 : vector<32x1xf32> to vector<32x32xf32>
    %83 = arith.subf %79, %82 : vector<32x32xf32>
    %84 = math.exp %83 : vector<32x32xf32>
    %cst_29 = arith.constant dense<0.000000e+00> : vector<32xf32>
    %85 = vector.multi_reduction <add>, %84, %cst_29 [1] : vector<32x32xf32> to vector<32xf32>
    %86 = vector.shape_cast %85 : vector<32xf32> to vector<32x1xf32>
    %87 = tpu.reciprocal %86 {approx = true} : vector<32x1xf32> -> vector<32x1xf32>
    %88 = vector.broadcast %87 : vector<32x1xf32> to vector<32x32xf32>
    %89 = arith.mulf %84, %88 : vector<32x32xf32>
    %cst_30 = arith.constant dense<0.000000e+00> : vector<32x8xf32>
    %90 = tpu.matmul %89, %45, %cst_30 {dimension_numbers = #tpu.dot_dimension_numbers<[1], [0], [0], [1], [0, 0, 1, 1], [], []>} : vector<32x32xf32>, vector<32x8xf32>, vector<32x8xf32> -> vector<32x8xf32>
    %c0_31 = arith.constant 0 : index
    %c0_32 = arith.constant 0 : index
    %91 = vector.load %arg6[%c0_31, %c0_32] : memref<32x32xf32, #tpu.memory_space<vmem>>, vector<32x32xf32>
    %c0_33 = arith.constant 0 : index
    %c0_34 = arith.constant 0 : index
    %92 = vector.load %arg7[%c0_33, %c0_34] : memref<1x32xf32, #tpu.memory_space<vmem>>, vector<1x32xf32>
    %93 = vector.extract_strided_slice %90 {offsets = [0, 0], sizes = [8, 8], strides = [1, 1]} : vector<32x8xf32> to vector<8x8xf32>
    %94 = vector.extract_strided_slice %91 {offsets = [0, 0], sizes = [8, 32], strides = [1, 1]} : vector<32x32xf32> to vector<8x32xf32>
    %cst_35 = arith.constant dense<0.000000e+00> : vector<8x32xf32>
    %95 = tpu.matmul %93, %94, %cst_35 {dimension_numbers = #tpu.dot_dimension_numbers<[1], [0], [0], [1], [0, 0, 1, 1], [], []>} : vector<8x8xf32>, vector<8x32xf32>, vector<8x32xf32> -> vector<8x32xf32>
    %96 = vector.broadcast %92 : vector<1x32xf32> to vector<8x32xf32>
    %97 = arith.addf %96, %95 : vector<8x32xf32>
    %98 = vector.extract_strided_slice %90 {offsets = [8, 0], sizes = [8, 8], strides = [1, 1]} : vector<32x8xf32> to vector<8x8xf32>
    %99 = vector.extract_strided_slice %91 {offsets = [8, 0], sizes = [8, 32], strides = [1, 1]} : vector<32x32xf32> to vector<8x32xf32>
    %cst_36 = arith.constant dense<0.000000e+00> : vector<8x32xf32>
    %100 = tpu.matmul %98, %99, %cst_36 {dimension_numbers = #tpu.dot_dimension_numbers<[1], [0], [0], [1], [0, 0, 1, 1], [], []>} : vector<8x8xf32>, vector<8x32xf32>, vector<8x32xf32> -> vector<8x32xf32>
    %101 = arith.addf %97, %100 : vector<8x32xf32>
    %102 = vector.extract_strided_slice %90 {offsets = [16, 0], sizes = [8, 8], strides = [1, 1]} : vector<32x8xf32> to vector<8x8xf32>
    %103 = vector.extract_strided_slice %91 {offsets = [16, 0], sizes = [8, 32], strides = [1, 1]} : vector<32x32xf32> to vector<8x32xf32>
    %cst_37 = arith.constant dense<0.000000e+00> : vector<8x32xf32>
    %104 = tpu.matmul %102, %103, %cst_37 {dimension_numbers = #tpu.dot_dimension_numbers<[1], [0], [0], [1], [0, 0, 1, 1], [], []>} : vector<8x8xf32>, vector<8x32xf32>, vector<8x32xf32> -> vector<8x32xf32>
    %105 = arith.addf %101, %104 : vector<8x32xf32>
    %106 = vector.extract_strided_slice %90 {offsets = [24, 0], sizes = [8, 8], strides = [1, 1]} : vector<32x8xf32> to vector<8x8xf32>
    %107 = vector.extract_strided_slice %91 {offsets = [24, 0], sizes = [8, 32], strides = [1, 1]} : vector<32x32xf32> to vector<8x32xf32>
    %cst_38 = arith.constant dense<0.000000e+00> : vector<8x32xf32>
    %108 = tpu.matmul %106, %107, %cst_38 {dimension_numbers = #tpu.dot_dimension_numbers<[1], [0], [0], [1], [0, 0, 1, 1], [], []>} : vector<8x8xf32>, vector<8x32xf32>, vector<8x32xf32> -> vector<8x32xf32>
    %109 = arith.addf %105, %108 : vector<8x32xf32>
    %110 = arith.addf %109, %1 : vector<8x32xf32>
    %cst_39 = arith.constant dense<0.000000e+00> : vector<8xf32>
    %111 = vector.multi_reduction <add>, %110, %cst_39 [1] : vector<8x32xf32> to vector<8xf32>
    %112 = vector.shape_cast %111 : vector<8xf32> to vector<8x1xf32>
    %cst_40 = arith.constant 3.200000e+01 : f32
    %113 = vector.broadcast %cst_40 : f32 to vector<8x1xf32>
    %114 = arith.divf %112, %113 : vector<8x1xf32>
    %115 = vector.broadcast %114 : vector<8x1xf32> to vector<8x32xf32>
    %116 = arith.subf %110, %115 : vector<8x32xf32>
    %117 = arith.mulf %116, %116 : vector<8x32xf32>
    %cst_41 = arith.constant dense<0.000000e+00> : vector<8xf32>
    %118 = vector.multi_reduction <add>, %117, %cst_41 [1] : vector<8x32xf32> to vector<8xf32>
    %119 = vector.shape_cast %118 : vector<8xf32> to vector<8x1xf32>
    %cst_42 = arith.constant 3.200000e+01 : f32
    %120 = vector.broadcast %cst_42 : f32 to vector<8x1xf32>
    %121 = arith.divf %119, %120 : vector<8x1xf32>
    %122 = vector.broadcast %114 : vector<8x1xf32> to vector<8x32xf32>
    %123 = arith.subf %110, %122 : vector<8x32xf32>
    %cst_43 = arith.constant 9.99999974E-6 : f32
    %124 = vector.broadcast %cst_43 : f32 to vector<8x1xf32>
    %125 = arith.addf %121, %124 : vector<8x1xf32>
    %126 = math.rsqrt %125 : vector<8x1xf32>
    %127 = vector.broadcast %126 : vector<8x1xf32> to vector<8x32xf32>
    %128 = arith.mulf %123, %127 : vector<8x32xf32>
    %129 = vector.broadcast %6 : vector<1x32xf32> to vector<8x32xf32>
    %130 = arith.mulf %128, %129 : vector<8x32xf32>
    %131 = vector.broadcast %7 : vector<1x32xf32> to vector<8x32xf32>
    %132 = arith.addf %130, %131 : vector<8x32xf32>
    %c0_44 = arith.constant 0 : index
    %c0_45 = arith.constant 0 : index
    %133 = vector.load %arg8[%c0_44, %c0_45] : memref<32x32xf32, #tpu.memory_space<vmem>>, vector<32x32xf32>
    %cst_46 = arith.constant dense<0.000000e+00> : vector<8x32xf32>
    %134 = tpu.matmul %132, %133, %cst_46 {dimension_numbers = #tpu.dot_dimension_numbers<[1], [0], [0], [1], [0, 0, 1, 1], [], []>} : vector<8x32xf32>, vector<32x32xf32>, vector<8x32xf32> -> vector<8x32xf32>
    %c0_47 = arith.constant 0 : index
    %c0_48 = arith.constant 0 : index
    %135 = vector.load %arg9[%c0_47, %c0_48] : memref<1x32xf32, #tpu.memory_space<vmem>>, vector<1x32xf32>
    %136 = vector.broadcast %135 : vector<1x32xf32> to vector<8x32xf32>
    %137 = arith.addf %134, %136 : vector<8x32xf32>
    %c0_49 = arith.constant 0 : index
    %c0_50 = arith.constant 0 : index
    %138 = vector.load %arg10[%c0_49, %c0_50] : memref<32x64xf32, #tpu.memory_space<vmem>>, vector<32x64xf32>
    %cst_51 = arith.constant dense<0.000000e+00> : vector<8x64xf32>
    %139 = tpu.matmul %3, %138, %cst_51 {dimension_numbers = #tpu.dot_dimension_numbers<[1], [0], [0], [1], [0, 0, 1, 1], [], []>} : vector<8x32xf32>, vector<32x64xf32>, vector<8x64xf32> -> vector<8x64xf32>
    %c0_52 = arith.constant 0 : index
    %c0_53 = arith.constant 0 : index
    %140 = vector.load %arg11[%c0_52, %c0_53] : memref<1x64xf32, #tpu.memory_space<vmem>>, vector<1x64xf32>
    %141 = vector.broadcast %140 : vector<1x64xf32> to vector<8x64xf32>
    %142 = arith.addf %139, %141 : vector<8x64xf32>
    %143 = vector.extract_strided_slice %142 {offsets = [0, 0], sizes = [8, 32], strides = [1, 1]} : vector<8x64xf32> to vector<8x32xf32>
    %144 = vector.extract_strided_slice %142 {offsets = [0, 32], sizes = [8, 32], strides = [1, 1]} : vector<8x64xf32> to vector<8x32xf32>
    %145 = vector.extract_strided_slice %137 {offsets = [0, 0], sizes = [8, 8], strides = [1, 1]} : vector<8x32xf32> to vector<8x8xf32>
    %146 = vector.extract_strided_slice %137 {offsets = [0, 8], sizes = [8, 8], strides = [1, 1]} : vector<8x32xf32> to vector<8x8xf32>
    %147 = vector.extract_strided_slice %137 {offsets = [0, 16], sizes = [8, 8], strides = [1, 1]} : vector<8x32xf32> to vector<8x8xf32>
    %148 = vector.extract_strided_slice %137 {offsets = [0, 24], sizes = [8, 8], strides = [1, 1]} : vector<8x32xf32> to vector<8x8xf32>
    %149 = tpu.concatenate %145, %146, %147, %148 in 0 : vector<8x8xf32>, vector<8x8xf32>, vector<8x8xf32>, vector<8x8xf32> -> vector<32x8xf32>
    %cst_54 = arith.constant dense<0.000000e+00> : vector<32x8xf32>
    %150 = tpu.matmul %19, %149, %cst_54 {dimension_numbers = #tpu.dot_dimension_numbers<[1], [0], [0], [1], [0, 0, 1, 1], [], []>} : vector<32x32xf32>, vector<32x8xf32>, vector<32x8xf32> -> vector<32x8xf32>
    %151 = vector.extract_strided_slice %143 {offsets = [0, 0], sizes = [8, 8], strides = [1, 1]} : vector<8x32xf32> to vector<8x8xf32>
    %152 = vector.extract_strided_slice %143 {offsets = [0, 8], sizes = [8, 8], strides = [1, 1]} : vector<8x32xf32> to vector<8x8xf32>
    %153 = vector.extract_strided_slice %143 {offsets = [0, 16], sizes = [8, 8], strides = [1, 1]} : vector<8x32xf32> to vector<8x8xf32>
    %154 = vector.extract_strided_slice %143 {offsets = [0, 24], sizes = [8, 8], strides = [1, 1]} : vector<8x32xf32> to vector<8x8xf32>
    %155 = tpu.concatenate %151, %152, %153, %154 in 0 : vector<8x8xf32>, vector<8x8xf32>, vector<8x8xf32>, vector<8x8xf32> -> vector<32x8xf32>
    %cst_55 = arith.constant dense<0.000000e+00> : vector<32x8xf32>
    %156 = tpu.matmul %19, %155, %cst_55 {dimension_numbers = #tpu.dot_dimension_numbers<[1], [0], [0], [1], [0, 0, 1, 1], [], []>} : vector<32x32xf32>, vector<32x8xf32>, vector<32x8xf32> -> vector<32x8xf32>
    %157 = vector.extract_strided_slice %144 {offsets = [0, 0], sizes = [8, 8], strides = [1, 1]} : vector<8x32xf32> to vector<8x8xf32>
    %158 = vector.extract_strided_slice %144 {offsets = [0, 8], sizes = [8, 8], strides = [1, 1]} : vector<8x32xf32> to vector<8x8xf32>
    %159 = vector.extract_strided_slice %144 {offsets = [0, 16], sizes = [8, 8], strides = [1, 1]} : vector<8x32xf32> to vector<8x8xf32>
    %160 = vector.extract_strided_slice %144 {offsets = [0, 24], sizes = [8, 8], strides = [1, 1]} : vector<8x32xf32> to vector<8x8xf32>
    %161 = tpu.concatenate %157, %158, %159, %160 in 0 : vector<8x8xf32>, vector<8x8xf32>, vector<8x8xf32>, vector<8x8xf32> -> vector<32x8xf32>
    %cst_56 = arith.constant dense<0.000000e+00> : vector<32x8xf32>
    %162 = tpu.matmul %19, %161, %cst_56 {dimension_numbers = #tpu.dot_dimension_numbers<[1], [0], [0], [1], [0, 0, 1, 1], [], []>} : vector<32x32xf32>, vector<32x8xf32>, vector<32x8xf32> -> vector<32x8xf32>
    %cst_57 = arith.constant dense<0.000000e+00> : vector<32x32xf32>
    %163 = tpu.matmul %150, %156, %cst_57 {dimension_numbers = #tpu.dot_dimension_numbers<[1], [1], [0], [0], [0, 0, 1, 0], [], []>} : vector<32x8xf32>, vector<32x8xf32>, vector<32x32xf32> -> vector<32x32xf32>
    %164 = tpu.iota {dimensions = array<i32: 0>} : vector<32x32xi32>
    %165 = tpu.iota {dimensions = array<i32: 1>} : vector<32x32xi32>
    %c-8_i32_58 = arith.constant -8 : i32
    %166 = vector.broadcast %c-8_i32_58 : i32 to vector<32x32xi32>
    %167 = arith.andi %164, %166 : vector<32x32xi32>
    %c8_i32_59 = arith.constant 8 : i32
    %168 = vector.broadcast %c8_i32_59 : i32 to vector<32x32xi32>
    %169 = arith.muli %167, %168 : vector<32x32xi32>
    %c-8_i32_60 = arith.constant -8 : i32
    %170 = vector.broadcast %c-8_i32_60 : i32 to vector<32x32xi32>
    %171 = arith.andi %165, %170 : vector<32x32xi32>
    %c8_i32_61 = arith.constant 8 : i32
    %172 = vector.broadcast %c8_i32_61 : i32 to vector<32x32xi32>
    %173 = arith.muli %171, %172 : vector<32x32xi32>
    %174 = arith.cmpi eq, %169, %173 : vector<32x32xi32>
    %cst_62 = arith.constant -1.000000e+30 : f32
    %175 = vector.broadcast %cst_62 : f32 to vector<32x32xf32>
    %176 = arith.select %174, %163, %175 : vector<32x32xi1>, vector<32x32xf32>
    %cst_63 = arith.constant dense<0xFF800000> : vector<32xf32>
    %177 = vector.multi_reduction <maximumf>, %176, %cst_63 [1] : vector<32x32xf32> to vector<32xf32>
    %178 = vector.shape_cast %177 : vector<32xf32> to vector<32x1xf32>
    %179 = vector.broadcast %178 : vector<32x1xf32> to vector<32x32xf32>
    %180 = arith.subf %176, %179 : vector<32x32xf32>
    %181 = math.exp %180 : vector<32x32xf32>
    %cst_64 = arith.constant dense<0.000000e+00> : vector<32xf32>
    %182 = vector.multi_reduction <add>, %181, %cst_64 [1] : vector<32x32xf32> to vector<32xf32>
    %183 = vector.shape_cast %182 : vector<32xf32> to vector<32x1xf32>
    %184 = tpu.reciprocal %183 {approx = true} : vector<32x1xf32> -> vector<32x1xf32>
    %185 = vector.broadcast %184 : vector<32x1xf32> to vector<32x32xf32>
    %186 = arith.mulf %181, %185 : vector<32x32xf32>
    %cst_65 = arith.constant dense<0.000000e+00> : vector<32x8xf32>
    %187 = tpu.matmul %186, %162, %cst_65 {dimension_numbers = #tpu.dot_dimension_numbers<[1], [0], [0], [1], [0, 0, 1, 1], [], []>} : vector<32x32xf32>, vector<32x8xf32>, vector<32x8xf32> -> vector<32x8xf32>
    %c0_66 = arith.constant 0 : index
    %c0_67 = arith.constant 0 : index
    %188 = vector.load %arg12[%c0_66, %c0_67] : memref<32x32xf32, #tpu.memory_space<vmem>>, vector<32x32xf32>
    %c0_68 = arith.constant 0 : index
    %c0_69 = arith.constant 0 : index
    %189 = vector.load %arg13[%c0_68, %c0_69] : memref<1x32xf32, #tpu.memory_space<vmem>>, vector<1x32xf32>
    %190 = vector.extract_strided_slice %187 {offsets = [0, 0], sizes = [8, 8], strides = [1, 1]} : vector<32x8xf32> to vector<8x8xf32>
    %191 = vector.extract_strided_slice %188 {offsets = [0, 0], sizes = [8, 32], strides = [1, 1]} : vector<32x32xf32> to vector<8x32xf32>
    %cst_70 = arith.constant dense<0.000000e+00> : vector<8x32xf32>
    %192 = tpu.matmul %190, %191, %cst_70 {dimension_numbers = #tpu.dot_dimension_numbers<[1], [0], [0], [1], [0, 0, 1, 1], [], []>} : vector<8x8xf32>, vector<8x32xf32>, vector<8x32xf32> -> vector<8x32xf32>
    %193 = vector.broadcast %189 : vector<1x32xf32> to vector<8x32xf32>
    %194 = arith.addf %193, %192 : vector<8x32xf32>
    %195 = vector.extract_strided_slice %187 {offsets = [8, 0], sizes = [8, 8], strides = [1, 1]} : vector<32x8xf32> to vector<8x8xf32>
    %196 = vector.extract_strided_slice %188 {offsets = [8, 0], sizes = [8, 32], strides = [1, 1]} : vector<32x32xf32> to vector<8x32xf32>
    %cst_71 = arith.constant dense<0.000000e+00> : vector<8x32xf32>
    %197 = tpu.matmul %195, %196, %cst_71 {dimension_numbers = #tpu.dot_dimension_numbers<[1], [0], [0], [1], [0, 0, 1, 1], [], []>} : vector<8x8xf32>, vector<8x32xf32>, vector<8x32xf32> -> vector<8x32xf32>
    %198 = arith.addf %194, %197 : vector<8x32xf32>
    %199 = vector.extract_strided_slice %187 {offsets = [16, 0], sizes = [8, 8], strides = [1, 1]} : vector<32x8xf32> to vector<8x8xf32>
    %200 = vector.extract_strided_slice %188 {offsets = [16, 0], sizes = [8, 32], strides = [1, 1]} : vector<32x32xf32> to vector<8x32xf32>
    %cst_72 = arith.constant dense<0.000000e+00> : vector<8x32xf32>
    %201 = tpu.matmul %199, %200, %cst_72 {dimension_numbers = #tpu.dot_dimension_numbers<[1], [0], [0], [1], [0, 0, 1, 1], [], []>} : vector<8x8xf32>, vector<8x32xf32>, vector<8x32xf32> -> vector<8x32xf32>
    %202 = arith.addf %198, %201 : vector<8x32xf32>
    %203 = vector.extract_strided_slice %187 {offsets = [24, 0], sizes = [8, 8], strides = [1, 1]} : vector<32x8xf32> to vector<8x8xf32>
    %204 = vector.extract_strided_slice %188 {offsets = [24, 0], sizes = [8, 32], strides = [1, 1]} : vector<32x32xf32> to vector<8x32xf32>
    %cst_73 = arith.constant dense<0.000000e+00> : vector<8x32xf32>
    %205 = tpu.matmul %203, %204, %cst_73 {dimension_numbers = #tpu.dot_dimension_numbers<[1], [0], [0], [1], [0, 0, 1, 1], [], []>} : vector<8x8xf32>, vector<8x32xf32>, vector<8x32xf32> -> vector<8x32xf32>
    %206 = arith.addf %202, %205 : vector<8x32xf32>
    %207 = arith.addf %206, %132 : vector<8x32xf32>
    %cst_74 = arith.constant dense<0.000000e+00> : vector<8xf32>
    %208 = vector.multi_reduction <add>, %207, %cst_74 [1] : vector<8x32xf32> to vector<8xf32>
    %209 = vector.shape_cast %208 : vector<8xf32> to vector<8x1xf32>
    %cst_75 = arith.constant 3.200000e+01 : f32
    %210 = vector.broadcast %cst_75 : f32 to vector<8x1xf32>
    %211 = arith.divf %209, %210 : vector<8x1xf32>
    %212 = vector.broadcast %211 : vector<8x1xf32> to vector<8x32xf32>
    %213 = arith.subf %207, %212 : vector<8x32xf32>
    %214 = arith.mulf %213, %213 : vector<8x32xf32>
    %cst_76 = arith.constant dense<0.000000e+00> : vector<8xf32>
    %215 = vector.multi_reduction <add>, %214, %cst_76 [1] : vector<8x32xf32> to vector<8xf32>
    %216 = vector.shape_cast %215 : vector<8xf32> to vector<8x1xf32>
    %cst_77 = arith.constant 3.200000e+01 : f32
    %217 = vector.broadcast %cst_77 : f32 to vector<8x1xf32>
    %218 = arith.divf %216, %217 : vector<8x1xf32>
    %219 = vector.broadcast %211 : vector<8x1xf32> to vector<8x32xf32>
    %220 = arith.subf %207, %219 : vector<8x32xf32>
    %cst_78 = arith.constant 9.99999974E-6 : f32
    %221 = vector.broadcast %cst_78 : f32 to vector<8x1xf32>
    %222 = arith.addf %218, %221 : vector<8x1xf32>
    %223 = math.rsqrt %222 : vector<8x1xf32>
    %224 = vector.broadcast %223 : vector<8x1xf32> to vector<8x32xf32>
    %225 = arith.mulf %220, %224 : vector<8x32xf32>
    %226 = vector.broadcast %6 : vector<1x32xf32> to vector<8x32xf32>
    %227 = arith.mulf %225, %226 : vector<8x32xf32>
    %228 = vector.broadcast %7 : vector<1x32xf32> to vector<8x32xf32>
    %229 = arith.addf %227, %228 : vector<8x32xf32>
    %c0_79 = arith.constant 0 : index
    %c0_80 = arith.constant 0 : index
    %230 = vector.load %arg16[%c0_79, %c0_80] : memref<32x64xf32, #tpu.memory_space<vmem>>, vector<32x64xf32>
    %cst_81 = arith.constant dense<0.000000e+00> : vector<8x64xf32>
    %231 = tpu.matmul %229, %230, %cst_81 {dimension_numbers = #tpu.dot_dimension_numbers<[1], [0], [0], [1], [0, 0, 1, 1], [], []>} : vector<8x32xf32>, vector<32x64xf32>, vector<8x64xf32> -> vector<8x64xf32>
    %c0_82 = arith.constant 0 : index
    %c0_83 = arith.constant 0 : index
    %232 = vector.load %arg17[%c0_82, %c0_83] : memref<1x64xf32, #tpu.memory_space<vmem>>, vector<1x64xf32>
    %233 = vector.broadcast %232 : vector<1x64xf32> to vector<8x64xf32>
    %234 = arith.addf %231, %233 : vector<8x64xf32>
    %cst_84 = arith.constant 0.000000e+00 : f32
    %235 = vector.broadcast %cst_84 : f32 to vector<8x64xf32>
    %236 = arith.maximumf %234, %235 : vector<8x64xf32>
    %c0_85 = arith.constant 0 : index
    %c0_86 = arith.constant 0 : index
    %237 = vector.load %arg18[%c0_85, %c0_86] : memref<64x32xf32, #tpu.memory_space<vmem>>, vector<64x32xf32>
    %cst_87 = arith.constant dense<0.000000e+00> : vector<8x32xf32>
    %238 = tpu.matmul %236, %237, %cst_87 {dimension_numbers = #tpu.dot_dimension_numbers<[1], [0], [0], [1], [0, 0, 1, 1], [], []>} : vector<8x64xf32>, vector<64x32xf32>, vector<8x32xf32> -> vector<8x32xf32>
    %c0_88 = arith.constant 0 : index
    %c0_89 = arith.constant 0 : index
    %239 = vector.load %arg19[%c0_88, %c0_89] : memref<1x32xf32, #tpu.memory_space<vmem>>, vector<1x32xf32>
    %240 = vector.broadcast %239 : vector<1x32xf32> to vector<8x32xf32>
    %241 = arith.addf %238, %240 : vector<8x32xf32>
    %242 = arith.addf %241, %229 : vector<8x32xf32>
    %cst_90 = arith.constant dense<0.000000e+00> : vector<8xf32>
    %243 = vector.multi_reduction <add>, %242, %cst_90 [1] : vector<8x32xf32> to vector<8xf32>
    %244 = vector.shape_cast %243 : vector<8xf32> to vector<8x1xf32>
    %cst_91 = arith.constant 3.200000e+01 : f32
    %245 = vector.broadcast %cst_91 : f32 to vector<8x1xf32>
    %246 = arith.divf %244, %245 : vector<8x1xf32>
    %247 = vector.broadcast %246 : vector<8x1xf32> to vector<8x32xf32>
    %248 = arith.subf %242, %247 : vector<8x32xf32>
    %249 = arith.mulf %248, %248 : vector<8x32xf32>
    %cst_92 = arith.constant dense<0.000000e+00> : vector<8xf32>
    %250 = vector.multi_reduction <add>, %249, %cst_92 [1] : vector<8x32xf32> to vector<8xf32>
    %251 = vector.shape_cast %250 : vector<8xf32> to vector<8x1xf32>
    %cst_93 = arith.constant 3.200000e+01 : f32
    %252 = vector.broadcast %cst_93 : f32 to vector<8x1xf32>
    %253 = arith.divf %251, %252 : vector<8x1xf32>
    %254 = vector.broadcast %246 : vector<8x1xf32> to vector<8x32xf32>
    %255 = arith.subf %242, %254 : vector<8x32xf32>
    %cst_94 = arith.constant 9.99999974E-6 : f32
    %256 = vector.broadcast %cst_94 : f32 to vector<8x1xf32>
    %257 = arith.addf %253, %256 : vector<8x1xf32>
    %258 = math.rsqrt %257 : vector<8x1xf32>
    %259 = vector.broadcast %258 : vector<8x1xf32> to vector<8x32xf32>
    %260 = arith.mulf %255, %259 : vector<8x32xf32>
    %261 = vector.broadcast %6 : vector<1x32xf32> to vector<8x32xf32>
    %262 = arith.mulf %260, %261 : vector<8x32xf32>
    %263 = vector.broadcast %7 : vector<1x32xf32> to vector<8x32xf32>
    %264 = arith.addf %262, %263 : vector<8x32xf32>
    %c0_95 = arith.constant 0 : index
    %c0_96 = arith.constant 0 : index
    %c0_97 = arith.constant 0 : index
    %265 = vector.load %arg20[%c0_95, %c0_96, %c0_97] : memref<1x8x32xf32, #tpu.memory_space<vmem>>, vector<1x8x32xf32>
    %266 = vector.shape_cast %265 : vector<1x8x32xf32> to vector<8x32xf32>
    %267 = vector.shape_cast %264 : vector<8x32xf32> to vector<1x8x32xf32>
    tpu.vector_store %arg20[%c0_95, %c0_96, %c0_97], %267 {strides = array<i32>} : memref<1x8x32xf32, #tpu.memory_space<vmem>>, vector<1x8x32xf32>,
    return
  }
  func.func @transform_0(%arg0: i32) -> (i32, i32, i32) {
    %c0_i32 = arith.constant 0 : i32
    %c0_i32_0 = arith.constant 0 : i32
    %c0_i32_1 = arith.constant 0 : i32
    return %arg0, %c0_i32, %c0_i32_0 : i32, i32, i32
  }
  func.func @transform_1(%arg0: i32) -> (i32, i32, i32) {
    %c0_i32 = arith.constant 0 : i32
    %c0_i32_0 = arith.constant 0 : i32
    %c0_i32_1 = arith.constant 0 : i32
    return %arg0, %c0_i32, %c0_i32_0 : i32, i32, i32
  }
  func.func @transform_2(%arg0: i32) -> (i32, i32, i32) {
    %c0_i32 = arith.constant 0 : i32
    %c0_i32_0 = arith.constant 0 : i32
    %c0_i32_1 = arith.constant 0 : i32
    return %arg0, %c0_i32, %c0_i32_0 : i32, i32, i32
  }
  func.func @transform_3(%arg0: i32) -> (i32, i32) {
    %c0_i32 = arith.constant 0 : i32
    %c0_i32_0 = arith.constant 0 : i32
    %c0_i32_1 = arith.constant 0 : i32
    return %c0_i32, %c0_i32_0 : i32, i32
  }
  func.func @transform_4(%arg0: i32) -> (i32, i32) {
    %c0_i32 = arith.constant 0 : i32
    %c0_i32_0 = arith.constant 0 : i32
    %c0_i32_1 = arith.constant 0 : i32
    return %c0_i32, %c0_i32_0 : i32, i32
  }
  func.func @transform_5(%arg0: i32) -> (i32, i32) {
    %c0_i32 = arith.constant 0 : i32
    %c0_i32_0 = arith.constant 0 : i32
    %c0_i32_1 = arith.constant 0 : i32
    return %c0_i32, %c0_i32_0 : i32, i32
  }
  func.func @transform_6(%arg0: i32) -> (i32, i32) {
    %c0_i32 = arith.constant 0 : i32
    %c0_i32_0 = arith.constant 0 : i32
    %c0_i32_1 = arith.constant 0 : i32
    return %c0_i32, %c0_i32_0 : i32, i32
  }
  func.func @transform_7(%arg0: i32) -> (i32, i32) {
    %c0_i32 = arith.constant 0 : i32
    %c0_i32_0 = arith.constant 0 : i32
    %c0_i32_1 = arith.constant 0 : i32
    return %c0_i32, %c0_i32_0 : i32, i32
  }
  func.func @transform_8(%arg0: i32) -> (i32, i32) {
    %c0_i32 = arith.constant 0 : i32
    %c0_i32_0 = arith.constant 0 : i32
    %c0_i32_1 = arith.constant 0 : i32
    return %c0_i32, %c0_i32_0 : i32, i32
  }
  func.func @transform_9(%arg0: i32) -> (i32, i32) {
    %c0_i32 = arith.constant 0 : i32
    %c0_i32_0 = arith.constant 0 : i32
    %c0_i32_1 = arith.constant 0 : i32
    return %c0_i32, %c0_i32_0 : i32, i32
  }
  func.func @transform_10(%arg0: i32) -> (i32, i32) {
    %c0_i32 = arith.constant 0 : i32
    %c0_i32_0 = arith.constant 0 : i32
    %c0_i32_1 = arith.constant 0 : i32
    return %c0_i32, %c0_i32_0 : i32, i32
  }
  func.func @transform_11(%arg0: i32) -> (i32, i32) {
    %c0_i32 = arith.constant 0 : i32
    %c0_i32_0 = arith.constant 0 : i32
    %c0_i32_1 = arith.constant 0 : i32
    return %c0_i32, %c0_i32_0 : i32, i32
  }
  func.func @transform_12(%arg0: i32) -> (i32, i32) {
    %c0_i32 = arith.constant 0 : i32
    %c0_i32_0 = arith.constant 0 : i32
    %c0_i32_1 = arith.constant 0 : i32
    return %c0_i32, %c0_i32_0 : i32, i32
  }
  func.func @transform_13(%arg0: i32) -> (i32, i32) {
    %c0_i32 = arith.constant 0 : i32
    %c0_i32_0 = arith.constant 0 : i32
    %c0_i32_1 = arith.constant 0 : i32
    return %c0_i32, %c0_i32_0 : i32, i32
  }
  func.func @transform_14(%arg0: i32) -> (i32, i32) {
    %c0_i32 = arith.constant 0 : i32
    %c0_i32_0 = arith.constant 0 : i32
    %c0_i32_1 = arith.constant 0 : i32
    return %c0_i32, %c0_i32_0 : i32, i32
  }
  func.func @transform_15(%arg0: i32) -> (i32, i32) {
    %c0_i32 = arith.constant 0 : i32
    %c0_i32_0 = arith.constant 0 : i32
    %c0_i32_1 = arith.constant 0 : i32
    return %c0_i32, %c0_i32_0 : i32, i32
  }
  func.func @transform_16(%arg0: i32) -> (i32, i32) {
    %c0_i32 = arith.constant 0 : i32
    %c0_i32_0 = arith.constant 0 : i32
    %c0_i32_1 = arith.constant 0 : i32
    return %c0_i32, %c0_i32_0 : i32, i32
  }
  func.func @transform_17(%arg0: i32) -> (i32, i32) {
    %c0_i32 = arith.constant 0 : i32
    %c0_i32_0 = arith.constant 0 : i32
    %c0_i32_1 = arith.constant 0 : i32
    return %c0_i32, %c0_i32_0 : i32, i32
  }
  func.func @transform_18(%arg0: i32) -> (i32, i32) {
    %c0_i32 = arith.constant 0 : i32
    %c0_i32_0 = arith.constant 0 : i32
    %c0_i32_1 = arith.constant 0 : i32
    return %c0_i32, %c0_i32_0 : i32, i32
  }
  func.func @transform_19(%arg0: i32) -> (i32, i32, i32) {
    %c0_i32 = arith.constant 0 : i32
    %c0_i32_0 = arith.constant 0 : i32
    %c0_i32_1 = arith.constant 0 : i32
    return %arg0, %c0_i32, %c0_i32_0 : i32, i32, i32
  }
}

</mosaic_0001>

<bundles_post_ra>
// kernel: decoder_layer.1
= control target key start
LH: loop header
LB: loop body
LE: loop exit
PB: predicated region body
PF: predicated region fallthrough
CT: control target
= control target key end

     0   :  { %s4645_s0 = inlined_call_operand.vmem [shape: f32[2,8,32], index: 0, kind: input, shape index: {}]   ;;  %s4646_s1 = inlined_call_operand.vmem [shape: f32[2,8,32], index: 1, kind: input, shape index: {}]   ;;  %s4647_s2 = inlined_call_operand.vmem [shape: f32[2,8,8], index: 2, kind: input, shape index: {}]   ;;  %s4648_s3 = inlined_call_operand.vmem [shape: f32[32,96], index: 3, kind: input, shape index: {}]   ;;  %s4649_s4 = inlined_call_operand.vmem [shape: f32[1,96], index: 4, kind: input, shape index: {}]   ;;  %s4650_s5 = inlined_call_operand.vmem [shape: f32[32,32], index: 5, kind: input, shape index: {}]   ;;  %s4651_s6 = inlined_call_operand.vmem [shape: f32[1,32], index: 6, kind: input, shape index: {}]   ;;  %s4652_s7 = inlined_call_operand.vmem [shape: f32[32,32], index: 7, kind: input, shape index: {}]   ;;  %s4653_s8 = inlined_call_operand.vmem [shape: f32[1,32], index: 8, kind: input, shape index: {}]   ;;  %s4654_s9 = inlined_call_operand.vmem [shape: f32[32,64], index: 9, kind: input, shape index: {}]   ;;  %s4655_s10 = inlined_call_operand.vmem [shape: f32[1,64], index: 10, kind: input, shape index: {}]   ;;  %s4656_s11 = inlined_call_operand.vmem [shape: f32[32,32], index: 11, kind: input, shape index: {}]   ;;  %s4657_s12 = inlined_call_operand.vmem [shape: f32[1,32], index: 12, kind: input, shape index: {}]   ;;  %s4658_s13 = inlined_call_operand.vmem [shape: f32[1,32], index: 13, kind: input, shape index: {}]   ;;  %s4659_s14 = inlined_call_operand.vmem [shape: f32[1,32], index: 14, kind: input, shape index: {}]   ;;  %s4660_s15 = inlined_call_operand.vmem [shape: f32[32,64], index: 15, kind: input, shape index: {}]   ;;  %s4661_s16 = inlined_call_operand.vmem [shape: f32[1,64], index: 16, kind: input, shape index: {}]   ;;  %s4662_s17 = inlined_call_operand.vmem [shape: f32[64,32], index: 17, kind: input, shape index: {}]   ;;  %s4663_s18 = inlined_call_operand.vmem [shape: f32[1,32], index: 18, kind: input, shape index: {}]   ;;  %s4664_s19 = inlined_call_operand.hbm [shape: f32[2,8,32], index: 19, kind: output, shape index: {}]  }
   0x1   :  { %4678 = sst [smem:[#allocation8_spill]] %s4645_s0 }
   0x2   :  { %4679 = sst [smem:[#allocation9_spill]] %s4646_s1 }
   0x3   :  { %4680 = sst [smem:[#allocation10_spill]] %s4647_s2 }
   0x4   :  { %4681 = sst [smem:[#allocation11_spill]] %s4648_s3 }
   0x5   :  { %4682 = sst [smem:[#allocation12_spill]] %s4649_s4 }
   0x6   :  { %4683 = sst [smem:[#allocation13_spill]] %s4650_s5 }
   0x7   :  { %24 = vsyncpa [#allocation3], 0 }
   0x8   :  { %26 = vsyncpa [#allocation3 + $0x1], 0  ;;  %s4110_s0 = smov 0   ;;  %s4112_s30 = smov 0  }
   0x9   :  { %s4114_s20 = smov 0   ;;  %s4116_s21 = smov 0  }
   0xa LB: > { %4684 = sst [smem:[#allocation5_spill]] %s3994_s20  ;;  %s4131_s1 = sadd.s32 4294967295, %s3998_s21   ;;  %s3998_s21 = sphi %s4116_s21, %s4701_s21   ;;  %s3994_s20 = sphi %s4114_s20, %s4703_s20   ;;  %s3990_s30 = sphi %s4112_s30, %s4705_s30   ;;  %s3986_s0 = sphi %s4110_s0, %s4704_s0  }
   0xb   : > { %s3202_s22 = sadd.s32 4294967294, %s3998_s21   ;;  %s4135_s2 = sadd.s32 1, %s3998_s21  }
   0xc   : > { %4685 = sst [smem:[#allocation6_spill]] %s4135_s2  ;;  %s453_s23 = sadd.s32 1, %s3994_s20 }
   0xd   : > { %s450_s24 = ssub.s32 %s3998_s21, %s4135_s2  ;;  %p463_p0 = scmp.ne.s32.totalorder %s3994_s20, %s3990_s30 }
   0xe   : > { %p451_p1 = scmp.eq.s32.totalorder %s450_s24, 0  ;;  %p464_p2 = scmp.eq.s32.totalorder %s4131_s1, 1 }
   0xf   : > { %p469_p3 = scmp.ne.s32.totalorder %s3990_s30, %s3986_s0  ;;  %p470_p4 = scmp.eq.s32.totalorder %s3202_s22, 1 }
  0x10   : > { %s4146_s25 = scalar_select %p451_p1, %s3994_s20, %s453_s23  }
  0x11   : > { %p4148_p5 = por %p464_p2, %p463_p0  ;;  %p4152_p6 = por %p470_p4, %p469_p3 }
  0x12   : > { %4686 = sst [smem:[#allocation7_spill]] %s4146_s25  ;;  %p3205_p7 = scmp.ge.s32.totalorder %s3998_s21, 1 }
  0x13   : > { %p557_p8 = scmp.lt.s32.totalorder %s3998_s21, 3 }
  0x15   : > { %p558_p9 = pnand %p3205_p7, %p557_p8 }
  0x16   : > { %s4689_s29 = sld [smem:[#allocation11_spill]] (!%p558_p9)  ;;  %v4000_v3 = vmov (!%p558_p9), 0.0|0.0   ;;  %vm4001_vm0 = vmmov (!%p558_p9), 0   ;;  %v4002_v6 = vmov (!%p558_p9), 0.0   ;;  %p620_p10 = scmp.lt.s32.totalorder (!%p558_p9), %s4131_s1, 1  ;;  %vm680_vm1 = vcmask (!%p558_p9), 261120  }
  0x17   : > { %561 = sbr.rel (%p558_p9) target bundleno = 4597 (0x11f5), region = 96  ;;  %3696 = vmatprep.subr.bf16.mxu0 (!%p558_p9), %v4000_v3  ;;  %3445 = vmatprep.mubr.msk.f32.mxu0 (!%p558_p9), %vm4001_vm0, %v4002_v6  ;;  %s4690_s23 = sld [smem:[#allocation8_spill]] (!%p558_p9)  ;;  %v637_v13 = vlaneseq (!%p558_p9)  ;;  %vm1055_vm7 = vcmask (!%p558_p9), 64512  }
  0x18   : > { %s4691_s4 = sld [smem:[#allocation12_spill]] (!%p558_p9)  ;;  %s4674_s28 = smov (!%p558_p9), 112   ;;  %vm4278_vm12 = vmpackc.low (!%p558_p9), %vm1055_vm7, %vm1055_vm7 }
  0x19   : > { %v4192_v14 = vshrl.u32 (!%p558_p9), %v637_v13, 7  ;;  %v4199_v18 = vand.u32 (!%p558_p9), 127, %v637_v13  ;;  %s4670_s22 = smov (!%p558_p9), 96   ;;  %s4692_s2 = sld [smem:[#allocation10_spill]] (!%p558_p9) }
  0x1a   : > { %s4695_s5 = sld [smem:[#allocation13_spill]] (!%p558_p9)  ;;  %s4700_s20 = smov (!%p558_p9), 96  }
  0x1b   : > { %v4195_v15 = vadd.s32 (!%p558_p9), 8, %v4192_v14  ;;  %v644_v16 = vand.u32 (!%p558_p9), 3, %v4192_v14  ;;  %v4202_v20 = vadd.s32 (!%p558_p9), 16, %v4192_v14  ;;  %v4205_v21 = vadd.s32 (!%p558_p9), 24, %v4192_v14 }
  0x1c   : > { %v669_v0 = vld [vmem:[%s4689_s29] sm:$0xff] (!%p558_p9)  ;;  %v670_v1 = vld [vmem:[%s4689_s29 + $0x8] sm:$0xff] (!%p558_p9)  ;;  %v671_v2 = vld [vmem:[%s4689_s29 + $0x10] sm:$0xff] (!%p558_p9)  ;;  %v656_v23 = vmul.u32 (!%p558_p9), 4, %v4199_v18  ;;  %v1165_v60 = vand.u32 (!%p558_p9), 7, %v4192_v14 }
  0x1d   : > { %v3697_v4 = vpack.c.bf16 (!%p558_p9), %v670_v1, %v669_v0  ;;  %v672_v5 = vld [vmem:[%s4689_s29 + $0x18] sm:$0xff] (!%p558_p9)  ;;  %s4676_s29 = smov (!%p558_p9), 120   ;;  %v645_v17 = vand.u32 (!%p558_p9), 3, %v4195_v15  ;;  %v648_v19 = vmul.u32 (!%p558_p9), 31, %v644_v16  ;;  %v646_v24 = vand.u32 (!%p558_p9), 3, %v4202_v20 }
  0x1e   : > { %v3700_v7 = vpack.c.bf16 %v672_v5, %v671_v2  ;;  %s621_s27 = scalar_select %p620_p10, %s4131_s1, 1  ;;  %v3214_v9 = vld [vmem:[%s4691_s4] ss:$0 sm:$0xff]  ;;  %v647_v26 = vand.u32 3, %v4205_v21  ;;  %v1166_v61 = vand.u32 7, %v4195_v15  ;;  %vm1169_vm6 = vcmp.eq.s32.totalorder %v4199_v18, %v1165_v60 }
  0x1f   : > { %3698 = vmatpush3.bf16.msra.mxu0 %v3697_v4  ;;  %v652_v22 = vadd.s32 %v648_v19, %v4192_v14  ;;  %v649_v25 = vmul.u32 31, %v645_v17  ;;  %v650_v28 = vmul.u32 31, %v646_v24  ;;  %v1167_v62 = vand.u32 7, %v4202_v20 }
  0x20   : > { %3699 = vmatprep.subr.bf16.mxu0 %v4000_v3  ;;  %s4176_s25 = sshll.u32 %s621_s27, 3  ;;  %s4672_s27 = smov 104   ;;  %v651_v33 = vmul.u32 31, %v647_v26  ;;  %v3236_v63 = vsel %vm1169_vm6, 1.0, %v4002_v6  ;;  %vm1170_vm8 = vcmp.eq.s32.totalorder %v4199_v18, %v1166_v61  ;;  %v1168_v0 = vand.u32 7, %v4205_v21 }
  0x21   : > { %s623_s24 = scalar_lea.vmem %s4690_s23, %s4176_s25  ;;  %vm657_vm2 = vcmp.eq.s32.totalorder %v656_v23, %v652_v22  ;;  %v653_v30 = vadd.s32 %v649_v25, %v4195_v15  ;;  %v654_v34 = vadd.s32 %v650_v28, %v4202_v20  ;;  %s4007_s23 = smov 64   ;;  %vm1171_vm9 = vcmp.eq.s32.totalorder %v4199_v18, %v1167_v62 }
  0x22   : > { %v4182_v8 = vld [vmem:[%s623_s24] sm:$0xff]  ;;  %v4212_v27 = vsel %vm657_vm2, 1.0, %v4002_v6  ;;  %v655_v39 = vadd.s32 %v651_v33, %v4205_v21  ;;  %v3237_v1 = vsel %vm1170_vm8, 1.0, %v4002_v6  ;;  %v3238_v2 = vsel %vm1171_vm9, 1.0, %v4002_v6 }
  0x23   : > { %3701 = vmatpush3.bf16.msra.mxu0 %v3700_v7  ;;  %3456 = vmatprep.mubr.msk.f32.mxu1 %vm680_vm1, %v4212_v27  ;;  %vm658_vm3 = vcmp.eq.s32.totalorder %v656_v23, %v653_v30  ;;  %vm659_vm4 = vcmp.eq.s32.totalorder %v656_v23, %v654_v34  ;;  %vm1172_vm10 = vcmp.eq.s32.totalorder %v4199_v18, %v1168_v0  ;;  %v1181_v5 = vand.u32 7, %v4199_v18 }
  0x24   : > { %v4224_v40 = vsel %vm658_vm3, 1.0, %v4002_v6  ;;  %v4227_v41 = vsel %vm659_vm4, 1.0, %v4002_v6  ;;  %vm660_vm5 = vcmp.eq.s32.totalorder %v656_v23, %v655_v39  ;;  %v3239_v4 = vsel %vm1172_vm10, 1.0, %v4002_v6 }
  0x25   : > { %v4234_v42 = vsel %vm660_vm5, 1.0, %v4002_v6  ;;  %vm1182_vm11 = vcmp.eq.s32.totalorder %v4192_v14, %v1181_v5 }
  0x26   : > { %3446 = vmatmul.mubr.msk.f32.vlgmr.msra.gmra.mrb[0].mxu0 %vm680_vm1, %v4182_v8 }
  0x27   : > { %3470 = vmatprep.mubr.msk.f32.mxu0 %vm680_vm1, %v4212_v27 }
  0xf9   : > { %v750_v10 = vpop.f32.mrb[0].mxu0 }
  0xfa   : > { %v751_v11 = vadd.f32 %v3214_v9, %v750_v10  ;;  %v3447_v12 = vpop.f32.mrb[1].mxu0  ;;  %v4008_v10 = vmov 1.0  }
  0xfc   : > { %761 = vrot.lane.b32.xlu1 %v751_v11, %s4672_s27  ;;  %755 = vrot.lane.b32.xlu0 %v751_v11, %s4676_s29  ;;  %s4698_s29 = smov 112   ;;  %s4699_s27 = smov 104  }
 0x100   : > { %758 = vrot.lane.b32.xlu0 %v751_v11, %s4674_s28  ;;  %s3299_s28 = sshll.u32 %s4131_s1, 7 }
 0x16e   : > { %v756_v29 = vpop.permute.xlu0 %755  ;;  %v762_v35 = vpop.permute.xlu1 %761 }
 0x16f   : > { %v3868_v31 = vpack.i.bf16 %v756_v29, %v751_v11  ;;  %v3702_v32 = vpack.c.bf16 %v756_v29, %v751_v11 }
 0x171   : > { %3703 = vmatprep.subr.bf16.mxu1 %v3702_v32  ;;  %3869 = vrot.lane.b32.xlu1 %v3868_v31, %s4670_s22 }
 0x172   : > { %3705 = vmatpush3.bf16.msra.mxu1 %v3702_v32  ;;  %v759_v36 = vpop.permute.xlu0 %758 }
 0x173   : > { %v3706_v37 = vpack.c.bf16 %v762_v35, %v759_v36  ;;  %v3873_v38 = vpack.i.bf16 %v762_v35, %v759_v36  ;;  %v1388_v36 = vand.u32 4294967288, %v4195_v15 }
 0x175   : > { %3879 = vrot.lane.b32.xlu1 %v3868_v31, %s4007_s23  ;;  %3707 = vmatprep.subr.bf16.mxu1 %v3706_v37 }
 0x176   : > { %3874 = vrot.lane.b32.xlu0 %v3873_v38, %s4670_s22  ;;  %3709 = vmatpush3.bf16.msra.mxu1 %v3706_v37  ;;  %v1395_v37 = vand.u32 4294967288, %v4199_v18 }
 0x179   : > { %3457 = vmatmul.mubr.msk.f32.vlgmr.msra.gmra.mrb[0].mxu1 %vm680_vm1, %v4224_v40 }
 0x17a   : > { %3884 = vrot.lane.b32.xlu0 %v3873_v38, %s4007_s23  ;;  %3459 = vmatprep.mubr.msk.f32.mxu1 %vm680_vm1, %v4227_v41  ;;  %s631_s23 = scalar_lea.vmem %s4692_s2, %s4176_s25  ;;  %v1387_v38 = vand.u32 4294967288, %v4192_v14 }
 0x17b   : > { %v634_v59 = vld [vmem:[%s631_s23] sm:$0xff]  ;;  %s4696_s23 = sld [smem:[#allocation9_spill]] }
 0x17d   : > { %3460 = vmatmul.mubr.msk.f32.gmra.mrb[2].mxu1 %vm680_vm1, %v4234_v42 }
 0x17e   : > { %3484 = vmatprep.mubr.msk.f32.mxu1 %vm680_vm1, %v4212_v27 }
 0x1e3   : > { %v3870_v43 = vpop.permute.xlu1 %3869 }
 0x1e4   : > { %v3872_v44 = vunpack.i.h.bf16 %v3870_v43  ;;  %v3871_v45 = vunpack.i.l.bf16 %v3870_v43  ;;  %v4303_v43 = vmul.u32 8, %v1388_v36 }
 0x1e6   : > { %v3710_v46 = vpack.c.bf16 %v3872_v44, %v3871_v45  ;;  %v4305_v44 = vmul.u32 8, %v1395_v37  ;;  %v1390_v45 = vand.u32 4294967288, %v4205_v21 }
 0x1e7   : > { %v3880_v47 = vpop.permute.xlu1 %3879 }
 0x1e8   : > { %v3882_v48 = vunpack.i.h.bf16 %v3880_v47  ;;  %v3881_v49 = vunpack.i.l.bf16 %v3880_v47  ;;  %v3875_v50 = vpop.permute.xlu0 %3874  ;;  %3711 = vmatprep.subr.bf16.mxu0 %v3710_v46  ;;  %v4308_v47 = vmul.u32 8, %v1387_v38  ;;  %vm1398_vm13 = vcmp.eq.s32.totalorder %v4303_v43, %v4305_v44 }
 0x1e9   : > { %v3877_v51 = vunpack.i.h.bf16 %v3875_v50  ;;  %v3876_v52 = vunpack.i.l.bf16 %v3875_v50  ;;  %3713 = vmatpush3.bf16.msra.mxu0 %v3710_v46  ;;  %v4313_v15 = vmul.u32 8, %v1390_v45 }
 0x1ea   : > { %v3718_v53 = vpack.c.bf16 %v3882_v48, %v3881_v49  ;;  %v1389_v48 = vand.u32 4294967288, %v4202_v20  ;;  %vm1397_vm15 = vcmp.eq.s32.totalorder %v4308_v47, %v4305_v44 }
 0x1eb   : > { %v3714_v54 = vpack.c.bf16 %v3877_v51, %v3876_v52  ;;  %vm1400_vm3 = vcmp.eq.s32.totalorder %v4313_v15, %v4305_v44 }
 0x1ec   : > { %v3885_v55 = vpop.permute.xlu0 %3884  ;;  %3719 = vmatprep.subr.bf16.mxu1 %v3718_v53  ;;  %v4317_v50 = vmul.u32 8, %v1389_v48 }
 0x1ed   : > { %v3887_v56 = vunpack.i.h.bf16 %v3885_v55  ;;  %v3886_v57 = vunpack.i.l.bf16 %v3885_v55  ;;  %3715 = vmatprep.subr.bf16.mxu0 %v3714_v54  ;;  %3721 = vmatpush3.bf16.msra.mxu1 %v3718_v53 }
 0x1ee   : > { %3717 = vmatpush3.bf16.msra.mxu0 %v3714_v54  ;;  %vm1399_vm5 = vcmp.eq.s32.totalorder %v4317_v50, %v4305_v44 }
 0x1ef   : > { %v3722_v58 = vpack.c.bf16 %v3887_v56, %v3886_v57 }
 0x1f1   : > { %3471 = vmatmul.mubr.msk.f32.vlgmr.msra.gmra.mrb[2].mxu0 %vm680_vm1, %v4224_v40  ;;  %3723 = vmatprep.subr.bf16.mxu1 %v3722_v58 }
 0x1f2   : > { %3725 = vmatpush3.bf16.msra.mxu1 %v3722_v58  ;;  %3473 = vmatprep.mubr.msk.f32.mxu0 %vm680_vm1, %v4227_v41 }
 0x1f3   : > { %3504 = vmatprep.subr.mxu1 %v634_v59 }
 0x1f5   : > { %3485 = vmatmul.mubr.msk.f32.vlgmr.msra.gmra.mrb[4].mxu1 %vm680_vm1, %v4224_v40  ;;  %3474 = vmatmul.mubr.msk.f32.gmra.mrb[4].mxu0 %vm680_vm1, %v4234_v42 }
 0x1f6   : > { %3487 = vmatprep.mubr.msk.f32.mxu1 %vm680_vm1, %v4227_v41  ;;  %3505 = vmatpush3.msra.mxu1 %v634_v59 }
 0x1f7   : > { %3512 = vmatprep.subr.msk.mxu1 %vm1182_vm11, %v4008_v10 }
 0x1f9   : > { %3488 = vmatmul.mubr.msk.f32.gmra.mrb[6].mxu1 %vm680_vm1, %v4234_v42 }
 0x1fa   : > { %3506 = vmatprep.mubr.msk.f32.mxu1 %vm1055_vm7, %v3236_v63 }
 0x1fd   : > { %3507 = vmatmul.mubr.msk.f32.vlgmr.msra.gmra.mrb[8].mxu1 %vm1055_vm7, %v3237_v1 }
 0x1fe   : > { %3509 = vmatprep.mubr.msk.f32.mxu1 %vm1055_vm7, %v3238_v2  ;;  %3513 = vmatpush3.msk.msra.mxu1 %vm1182_vm11, %v4008_v10 }
 0x1ff   : > { %3539 = vmatprep.subr.mxu1 %v4002_v6 }
 0x201   : > { %3510 = vmatmul.mubr.msk.f32.gmra.mrb[10].mxu1 %vm1055_vm7, %v3239_v4 }
 0x24c   : > { %v3458_v7 = vpop.f32.mrb[0].mxu1 }
 0x24d   : > { %v842_v9 = vpop.f32.mrb[1].mxu1 }
 0x24e   : > { %3498 = vmatprep.mubr.msk.f32.mxu0 %vm1055_vm7, %v842_v9 }
 0x250   : > { %v3461_v11 = vpop.f32.mrb[2].mxu1 }
 0x251   : > { %v852_v12 = vpop.f32.mrb[3].mxu1 }
 0x2c4   : > { %v3472_v13 = vpop.f32.mrb[2].mxu0 }
 0x2c5   : > { %v939_v16 = vpop.f32.mrb[3].mxu0 }
 0x2c6   : > { %v3726_v19 = vpack.c.bf16 %v3472_v13, %v939_v16 }
 0x2c8   : > { %3728 = vmatprep.subr.msk.bf16.mxu0 %vm4278_vm12, %v3726_v19  ;;  %v3475_v22 = vpop.f32.mrb[4].mxu0  ;;  %v3486_v23 = vpop.f32.mrb[4].mxu1 }
 0x2c9   : > { %3731 = vmatpush3.bf16.xpose.msk.msra.mxu0 %vm4278_vm12, %v3726_v19  ;;  %v949_v24 = vpop.f32.mrb[5].mxu0  ;;  %v1036_v25 = vpop.f32.mrb[5].mxu1 }
 0x2ca   : > { %v3732_v26 = vpack.c.bf16 %v3475_v22, %v949_v24  ;;  %v3738_v28 = vpack.c.bf16 %v3486_v23, %v1036_v25 }
 0x2cc   : > { %v3489_v29 = vpop.f32.mrb[6].mxu1  ;;  %3734 = vmatprep.subr.msk.bf16.mxu0 %vm4278_vm12, %v3732_v26 }
 0x2cd   : > { %v1046_v30 = vpop.f32.mrb[7].mxu1 }
 0x2ce   : > { %v3742_v31 = vpack.c.bf16 %v3489_v29, %v1046_v30  ;;  %v1547_v30 = vld [vmem:[%s4695_s5 + $0x8] sm:$0xff] }
 0x2d0   : > { %v3508_v32 = vpop.f32.mrb[8].mxu1 }
 0x2d1   : > { %3737 = vmatpush3.bf16.xpose.msk.msra.mxu0 %vm4278_vm12, %v3732_v26  ;;  %v1263_v33 = vpop.f32.mrb[9].mxu1 }
 0x2d2   : > { %3739 = vmatprep.subr.bf16.mxu0 %v3738_v28  ;;  %3514 = vmatprep.mubr.msk.f32.mxu1 %vm1055_vm7, %v1263_v33 }
 0x2d3   : > { %3515 = vmatmul.mubr.msk.f32.vlgmr.msra.gmra.mrb[12].mxu1 %vm1055_vm7, %v3508_v32 }
 0x2d4   : > { %v3511_v34 = vpop.f32.mrb[10].mxu1  ;;  %3540 = vmatpush3.msra.mxu1 %v1547_v30 }
 0x2d5   : > { %v1273_v35 = vpop.f32.mrb[11].mxu1  ;;  %3549 = vmatprep.subr.mxu1 %v4002_v6 }
 0x2d6   : > { %3517 = vmatprep.mubr.msk.f32.mxu1 %vm1055_vm7, %v1273_v35 }
 0x2d7   : > { %3518 = vmatmul.mubr.msk.f32.gmra.mrb[14].mxu1 %vm1055_vm7, %v3511_v34 }
 0x2d8   : > { %3499 = vmatmul.mubr.msk.f32.vlgmr.msra.gmra.mrb[6].mxu0 %vm1055_vm7, %v3458_v7  ;;  %3541 = vmatprep.mubr.msk.f32.mxu1 %vm4001_vm0, %v4002_v6 }
 0x2d9   : > { %3501 = vmatprep.mubr.msk.f32.mxu0 %vm1055_vm7, %v852_v12  ;;  %3741 = vmatpush3.bf16.msra.mxu0 %v3738_v28 }
 0x2da   : > { %3743 = vmatprep.subr.bf16.mxu0 %v3742_v31 }
 0x2dc   : > { %3502 = vmatmul.mubr.msk.f32.gmra.mrb[8].mxu0 %vm1055_vm7, %v3461_v11 }
 0x2dd   : > { %3745 = vmatpush3.bf16.msra.mxu0 %v3742_v31 }
 0x2de   : > { %3534 = vmatprep.subr.mxu0 %v4002_v6 }
 0x3a6   : > { %v3516_v39 = vpop.f32.mrb[12].mxu1 }
 0x3a7   : > { %v1360_v46 = vpop.f32.mrb[13].mxu1  ;;  %vm1380_vm14 = vcmp.eq.f32.partialorder %v3516_v39, 0.0  ;;  %v1546_v39 = vld [vmem:[%s4695_s5] sm:$0xff] }
 0x3a8   : > { %vm1379_vm2 = vcmp.eq.f32.partialorder %v1360_v46, 0.0 }
 0x3aa   : > { %v3519_v49 = vpop.f32.mrb[14].mxu1 }
 0x3ab   : > { %v3500_v14 = vpop.f32.mrb[6].mxu0  ;;  %v1370_v18 = vpop.f32.mrb[15].mxu1  ;;  %vm1382_vm4 = vcmp.eq.f32.partialorder %v3519_v49, 0.0 }
 0x3ac   : > { %v1384_v21 = vsel %vm1380_vm14, -1e+09, %v3500_v14  ;;  %v1146_v51 = vpop.f32.mrb[7].mxu0  ;;  %vm1381_vm6 = vcmp.eq.f32.partialorder %v1370_v18, 0.0  ;;  %v1549_v14 = vld [vmem:[%s4695_s5 + $0x18] sm:$0xff] }
 0x3ad   : > { %v1383_v52 = vsel %vm1379_vm2, -1e+09, %v1146_v51  ;;  %v1402_v20 = vsel %vm1398_vm13, %v1384_v21, -1e+30  ;;  %v1548_v21 = vld [vmem:[%s4695_s5 + $0x10] sm:$0xff]  ;;  %s627_s5 = scalar_lea.vmem %s4696_s23, %s4176_s25  ;;  %s4697_s23 = smov 120  }
 0x3ae   : > { %v1408_v53 = vsel %vm680_vm1, %v1402_v20, -inf  ;;  %v1401_v54 = vsel %vm1397_vm15, %v1383_v52, -1e+30  ;;  %s617_s25 = sand.u32 1, %s3990_s30  }
 0x3af   : > { %1409 = vmax.xlane.f32.xlu0 %v1408_v53  ;;  %v3503_v55 = vpop.f32.mrb[8].mxu0  ;;  %v1405_v56 = vsel %vm680_vm1, %v1401_v54, -inf  ;;  %v3255_v53 = vld [vmem:[%s4651_s6] ss:$0 sm:$0xff] }
 0x3b0   : > { %v1386_v57 = vsel %vm1382_vm4, -1e+09, %v3503_v55  ;;  %1406 = vmax.xlane.f32.xlu1 %v1405_v56  ;;  %v1156_v58 = vpop.f32.mrb[9].mxu0 }
 0x3b1   : > { %v1385_v59 = vsel %vm1381_vm6, -1e+09, %v1156_v58  ;;  %v1404_v60 = vsel %vm1400_vm3, %v1386_v57, -1e+30 }
 0x3b2   : > { %v1414_v61 = vsel %vm680_vm1, %v1404_v60, -inf  ;;  %v1403_v62 = vsel %vm1399_vm5, %v1385_v59, -1e+30 }
 0x3b3   : > { %v1411_v63 = vsel %vm680_vm1, %v1403_v62, -inf }
 0x3b4   : > { %1415 = vmax.xlane.f32.xlu1 %v1414_v61  ;;  %1412 = vmax.xlane.f32.xlu0 %v1411_v63 }
 0x43c   : > { %v1410_v0 = vpop.xlane.xlu0 %1409 }
 0x43d   : > { %v1418_v1 = vsub.f32 %v1402_v20, %v1410_v0  ;;  %v1407_v2 = vpop.xlane.xlu1 %1406 }
 0x43e   : > { %v1417_v4 = vsub.f32 %v1401_v54, %v1407_v2 }
 0x43f   : > { %v1423_v5 = vmul.f32 1.442695, %v1418_v1 }
 0x440   : > { %v1421_v7 = vmul.f32 1.442695, %v1417_v4 }
 0x441   : > { %3898 = vpow2.f32 %v1423_v5  ;;  %v1416_v9 = vpop.xlane.xlu1 %1415  ;;  %v1413_v10 = vpop.xlane.xlu0 %1412  ;;  %v1966_v5 = vld [vmem:[%s4654_s9] sm:$0xff] }
 0x442   : > { %3900 = vpow2.f32 %v1421_v7  ;;  %v1420_v11 = vsub.f32 %v1404_v60, %v1416_v9  ;;  %v1419_v12 = vsub.f32 %v1403_v62, %v1413_v10  ;;  %v1967_v7 = vld [vmem:[%s4654_s9 + $0x8] sm:$0xff]  ;;  %v1968_v9 = vld [vmem:[%s4654_s9 + $0x10] sm:$0xff] }
 0x443   : > { %v3753_v10 = vpack.c.bf16 %v1967_v7, %v1966_v5 }
 0x444   : > { %v1427_v13 = vmul.f32 1.442695, %v1420_v11  ;;  %v1425_v16 = vmul.f32 1.442695, %v1419_v12  ;;  %v633_v12 = vld [vmem:[%s627_s5] sm:$0xff]  ;;  %s3206_s5 = sshll.u32 %s617_s25, 3 }
 0x445   : > { %s619_s22 = scalar_lea.vmem [#allocation2], %s3206_s5 }
 0x446   : > { %3902 = vpow2.f32 %v1427_v13  ;;  %s3119_s24 = sshll.u32 %s619_s22, 4  ;;  %s4604_s24 = int_to_ptr.vmem [resolvable:$true] %s3119_s24 }
 0x447   : > { %3904 = vpow2.f32 %v1425_v16  ;;  %s3936_s1 = scalar_lea.vmem %s4604_s24, 128 }
 0x448   : > { %p3937_p11 = scmp.ne.s32.totalorder %s4604_s24, %s3936_s1 }
 0x44a   : > { %p3938_p12 = pnand %p3937_p11, %p4148_p5 }
 0x44b   : > { %v3899_v19 = vpop.eup %3898 }
 0x44c   : > { %v3901_v22 = vpop.eup %3900  ;;  %v1432_v23 = vsel %vm680_vm1, %v3899_v19, 0.0  ;;  %p3939_p13 = pneg %p3938_p12 }
 0x44d   : > { %1433 = vadd.xlane.f32.xlu1 %v1432_v23  ;;  %v1429_v24 = vsel %vm680_vm1, %v3901_v22, 0.0 }
 0x44e   : > { %1430 = vadd.xlane.f32.xlu0 %v1429_v24  ;;  %v1882_v24 = vld [vmem:[%s4652_s7] sm:$0xff] }
 0x450   : > { %v3903_v25 = vpop.eup %3902 }
 0x451   : > { %v3905_v26 = vpop.eup %3904  ;;  %v1438_v28 = vsel %vm680_vm1, %v3903_v25, 0.0 }
 0x452   : > { %1439 = vadd.xlane.f32.xlu1 %v1438_v28  ;;  %v1435_v29 = vsel %vm680_vm1, %v3905_v26, 0.0  ;;  %v1884_v28 = vld [vmem:[%s4652_s7 + $0x10] sm:$0xff] }
 0x453   : > { %1436 = vadd.xlane.f32.xlu0 %v1435_v29  ;;  %v1885_v29 = vld [vmem:[%s4652_s7 + $0x18] sm:$0xff] }
 0x454   : > { %v3750_v30 = vpack.c.bf16 %v1885_v29, %v1884_v28 }
 0x4da   : > { %v1434_v31 = vpop.xlane.xlu1 %1433 }
 0x4db   : > { %3906 = vrcp.f32 %v1434_v31  ;;  %v1431_v32 = vpop.xlane.xlu0 %1430  ;;  %v3263_v31 = vld [vmem:[%s4655_s10] ss:$0 sm:$0xff] }
 0x4dc   : > { %3908 = vrcp.f32 %v1431_v32 }
 0x4df   : > { %v1440_v33 = vpop.xlane.xlu1 %1439 }
 0x4e0   : > { %3910 = vrcp.f32 %v1440_v33  ;;  %v1437_v34 = vpop.xlane.xlu0 %1436 }
 0x4e1   : > { %3912 = vrcp.f32 %v1437_v34 }
 0x4e5   : > { %v3907_v35 = vpop.eup %3906 }
 0x4e6   : > { %v3909_v36 = vpop.eup %3908  ;;  %v1446_v38 = vmul.f32 %v3907_v35, %v3899_v19 }
 0x4e7   : > { %v1445_v37 = vmul.f32 %v3909_v36, %v3901_v22 }
 0x4e9   : > { %3528 = vmatprep.mubr.msk.f32.mxu0 %vm680_vm1, %v1445_v37 }
 0x4ea   : > { %v3911_v45 = vpop.eup %3910  ;;  %3529 = vmatmul.mubr.msk.f32.vlgmr.msra.gmra.mrb[10].mxu0 %vm680_vm1, %v1446_v38 }
 0x4eb   : > { %v3913_v46 = vpop.eup %3912  ;;  %v1448_v48 = vmul.f32 %v3911_v45, %v3903_v25  ;;  %3535 = vmatpush3.msra.mxu0 %v1546_v39  ;;  %v1883_v25 = vld [vmem:[%s4652_s7 + $0x8] sm:$0xff]  ;;  %v4425_v39 = vld [vmem:[%s4658_s13] ss:$0 sm:$0xff] }
 0x4ec   : > { %v1447_v49 = vmul.f32 %v3913_v46, %v3905_v26  ;;  %3544 = vmatprep.subr.mxu0 %v4002_v6  ;;  %v3747_v26 = vpack.c.bf16 %v1883_v25, %v1882_v24  ;;  %v4430_v46 = vld [vmem:[%s4659_s14] ss:$0 sm:$0xff] }
 0x4ee   : > { %3531 = vmatprep.mubr.msk.f32.mxu0 %vm680_vm1, %v1447_v49 }
 0x4ef   : > { %3532 = vmatmul.mubr.msk.f32.gmra.mrb[12].mxu0 %vm680_vm1, %v1448_v48 }
 0x4f0   : > { %3536 = vmatprep.mubr.msk.f32.mxu0 %vm4001_vm0, %v4002_v6 }
 0x5bd   : > { %v3530_v18 = vpop.f32.mrb[10].mxu0 }
 0x5be   : > { %v1527_v51 = vpop.f32.mrb[11].mxu0  ;;  %3542 = vmatmul.mubr.msk.f32.vlgmr.msra.gmra.mrb[16].mxu1 %vm1055_vm7, %v3530_v18 }
 0x5bf   : > { %3537 = vmatmul.mubr.msk.f32.vlgmr.msra.gmra.mrb[14].mxu0 %vm1055_vm7, %v1527_v51  ;;  %3550 = vmatpush3.msra.mxu1 %v1549_v14 }
 0x5c0   : > { %3545 = vmatpush3.msra.mxu0 %v1548_v21  ;;  %3551 = vmatprep.mubr.msk.f32.mxu1 %vm4001_vm0, %v4002_v6 }
 0x5c1   : > { %3546 = vmatprep.mubr.msk.f32.mxu0 %vm4001_vm0, %v4002_v6  ;;  %3752 = vmatprep.subr.bf16.mxu1 %v4000_v3 }
 0x5c2   : > { %v3533_v52 = vpop.f32.mrb[12].mxu0  ;;  %3746 = vmatprep.subr.bf16.mxu0 %v4000_v3 }
 0x5c3   : > { %v1537_v20 = vpop.f32.mrb[13].mxu0  ;;  %3552 = vmatmul.mubr.msk.f32.vlgmr.msra.gmra.mrb[18].mxu1 %vm1055_vm7, %v3533_v52 }
 0x5c4   : > { %3547 = vmatmul.mubr.msk.f32.vlgmr.msra.gmra.mrb[16].mxu0 %vm1055_vm7, %v1537_v20  ;;  %3573 = vmatprep.mubr.msk.f32.mxu1 %vm4001_vm0, %v4002_v6  ;;  %v3261_v20 = vld [vmem:[%s4653_s8] ss:$0 sm:$0xff] }
 0x5c5   : > { %3562 = vmatprep.mubr.msk.f32.mxu0 %vm4001_vm0, %v4002_v6  ;;  %3754 = vmatpush3.bf16.msra.mxu1 %v3753_v10 }
 0x5c6   : > { %3755 = vmatprep.subr.bf16.mxu1 %v4000_v3  ;;  %3748 = vmatpush3.bf16.msra.mxu0 %v3747_v26 }
 0x5c7   : > { %3749 = vmatprep.subr.bf16.mxu0 %v4000_v3 }
 0x5ca   : > { %3751 = vmatpush3.bf16.msra.mxu0 %v3750_v30 }
 0x691   : > { %v1700_v54 = vpop.f32.mrb[16].mxu1 }
 0x692   : > { %v1620_v55 = vpop.f32.mrb[14].mxu0  ;;  %v3543_v56 = vpop.f32.mrb[17].mxu1 }
 0x693   : > { %v1630_v57 = vadd.f32 %v3255_v53, %v1620_v55  ;;  %v3538_v58 = vpop.f32.mrb[15].mxu0 }
 0x695   : > { %v1704_v59 = vadd.f32 %v1700_v54, %v1630_v57 }
 0x696   : > { %v1848_v60 = vpop.f32.mrb[18].mxu1 }
 0x697   : > { %v1774_v61 = vpop.f32.mrb[16].mxu0  ;;  %v3553_v62 = vpop.f32.mrb[19].mxu1 }
 0x698   : > { %v1778_v63 = vadd.f32 %v1774_v61, %v1704_v59  ;;  %v3548_v0 = vpop.f32.mrb[17].mxu0 }
 0x69a   : > { %v1852_v1 = vadd.f32 %v1848_v60, %v1778_v63 }
 0x69c   : > { %v1853_v2 = vadd.f32 %v1852_v1, %v4182_v8  ;;  %v1969_v8 = vld [vmem:[%s4654_s9 + $0x18] sm:$0xff] }
 0x69d   : > { %v3756_v11 = vpack.c.bf16 %v1969_v8, %v1968_v9 }
 0x69e   : > { %v1854_v4 = vsel %vm680_vm1, %v1853_v2, 0.0 }
 0x69f   : > { %1855 = vadd.xlane.f32.xlu0 %v1854_v4  ;;  %3757 = vmatpush3.bf16.msra.mxu1 %v3756_v11 }
 0x6a2   : > { %3574 = vmatmul.mubr.msk.f32.vlgmr.msra.gmra.mrb[20].mxu1 %vm680_vm1, %v633_v12 }
 0x6a3   : > { %3598 = vmatprep.mubr.msk.f32.mxu1 %vm680_vm1, %v4212_v27 }
 0x72c   : > { %v1856_v13 = vpop.xlane.xlu0 %1855 }
 0x72d   : > { %v1858_v16 = vmul.f32 0.03125, %v1856_v13 }
 0x72f   : > { %v1859_v19 = vsub.f32 %v1853_v2, %v1858_v16 }
 0x731   : > { %v1860_v22 = vmul.f32 %v1859_v19, %v1859_v19 }
 0x733   : > { %v1861_v23 = vsel %vm680_vm1, %v1860_v22, 0.0 }
 0x734   : > { %1862 = vadd.xlane.f32.xlu1 %v1861_v23 }
 0x775   : > { %v2046_v32 = vpop.f32.mrb[20].mxu1 }
 0x776   : > { %v2047_v33 = vadd.f32 %v3263_v31, %v2046_v32  ;;  %v3575_v34 = vpop.f32.mrb[21].mxu1 }
 0x778   : > { %2146 = vrot.lane.b32.xlu0 %v2047_v33, %s4697_s23  ;;  %2149 = vrot.lane.b32.xlu1 %v2047_v33, %s4698_s29 }
 0x77c   : > { %2152 = vrot.lane.b32.xlu1 %v2047_v33, %s4699_s27 }
 0x7c1   : > { %v1863_v35 = vpop.xlane.xlu1 %1862 }
 0x7c2   : > { %v1864_v36 = vmul.f32 0.03125, %v1863_v35 }
 0x7c4   : > { %v1865_v37 = vadd.f32 1e-05, %v1864_v36 }
 0x7c6   : > { %3914 = vrsqrt.f32 %v1865_v37 }
 0x7d0   : > { %v3915_v38 = vpop.eup %3914 }
 0x7d1   : > { %v1867_v45 = vmul.f32 %v3915_v38, %v1859_v19 }
 0x7d3   : > { %v1874_v48 = vmul.f32 %v4425_v39, %v1867_v45 }
 0x7d5   : > { %v4434_v49 = vadd.f32 %v4430_v46, %v1874_v48 }
 0x7d7   : > { %3563 = vmatmul.mubr.msk.f32.vlgmr.msra.gmra.mrb[18].mxu0 %vm680_vm1, %v4434_v49 }
 0x7d8   : > { %3584 = vmatprep.mubr.msk.f32.mxu0 %vm680_vm1, %v4212_v27 }
 0x7ea   : > { %v2147_v14 = vpop.permute.xlu0 %2146  ;;  %v2150_v21 = vpop.permute.xlu1 %2149 }
 0x7eb   : > { %v3766_v18 = vpack.c.bf16 %v2147_v14, %v2047_v33  ;;  %v3888_v56 = vpack.i.bf16 %v2147_v14, %v2047_v33 }
 0x7ed   : > { %3767 = vmatprep.subr.bf16.mxu1 %v3766_v18 }
 0x7ee   : > { %3769 = vmatpush3.bf16.msra.mxu1 %v3766_v18  ;;  %v2153_v51 = vpop.permute.xlu1 %2152 }
 0x7ef   : > { %v3770_v52 = vpack.c.bf16 %v2153_v51, %v2150_v21  ;;  %v3893_v57 = vpack.i.bf16 %v2153_v51, %v2150_v21 }
 0x7f1   : > { %3771 = vmatprep.subr.bf16.mxu1 %v3770_v52 }
 0x7f2   : > { %3773 = vmatpush3.bf16.msra.mxu1 %v3770_v52 }
 0x7f5   : > { %3599 = vmatmul.mubr.msk.f32.vlgmr.msra.gmra.mrb[22].mxu1 %vm680_vm1, %v4224_v40 }
 0x7f6   : > { %3601 = vmatprep.mubr.msk.f32.mxu1 %vm680_vm1, %v4227_v41 }
 0x7f9   : > { %3602 = vmatmul.mubr.msk.f32.gmra.mrb[24].mxu1 %vm680_vm1, %v4234_v42 }
 0x8aa   : > { %v1962_v53 = vpop.f32.mrb[18].mxu0 }
 0x8ab   : > { %v1963_v54 = vadd.f32 %v3261_v20, %v1962_v53  ;;  %v3564_v55 = vpop.f32.mrb[19].mxu0 }
 0x8ad   : > { %2054 = vrot.lane.b32.xlu1 %v1963_v54, %s4698_s29  ;;  %2051 = vrot.lane.b32.xlu0 %v1963_v54, %s4697_s23  ;;  %s4602_s23 = scalar_lea.hbm %s4664_s19, %s3299_s28  ;;  %s3106_s29 = scalar_lea.sflag [#allocation3], %s617_s25 }
 0x8b1   : > { %3889 = vrot.lane.b32.xlu1 %v3888_v56, %s4700_s20  ;;  %2057 = vrot.lane.b32.xlu0 %v1963_v54, %s4699_s27  ;;  %s4009_s27 = smov [#allocation2]  }
 0x8b2   : > { %s3940_s4 = sshll.u32 %s4009_s27, 4  ;;  %s3941_s4 = int_to_ptr.vmem [resolvable:$false] %s3940_s4 }
 0x8b3   : > { %s3942_s5 = scalar_lea.vmem %s3941_s4, 256  ;;  %p3943_p0 = scmp.lt.s32.totalorder %s4604_s24, %s3941_s4 }
 0x8b4   : > { %p3944_p1 = scmp.lt.s32.totalorder %s3942_s5, %s3936_s1 }
 0x8b5   : > { %3894 = vrot.lane.b32.xlu0 %v3893_v57, %s4700_s20 }
 0x8b6   : > { %p3945_p2 = por %p3944_p1, %p3943_p0 }
 0x8b8   : > { %p3946_p3 = pnand %p3945_p2, %p3939_p13 }
 0x8c8   : > { %v3600_v58 = vpop.f32.mrb[22].mxu1 }
 0x8c9   : > { %v2221_v59 = vpop.f32.mrb[23].mxu1 }
 0x8ca   : > { %v3782_v60 = vpack.c.bf16 %v3600_v58, %v2221_v59 }
 0x8cc   : > { %3784 = vmatprep.subr.msk.bf16.mxu1 %vm4278_vm12, %v3782_v60  ;;  %v3603_v61 = vpop.f32.mrb[24].mxu1 }
 0x8cd   : > { %3787 = vmatpush3.bf16.xpose.msk.msra.mxu1 %vm4278_vm12, %v3782_v60  ;;  %v2231_v62 = vpop.f32.mrb[25].mxu1  ;;  %v2592_v60 = vld [vmem:[%s4656_s11 + $0x8] sm:$0xff] }
 0x8ce   : > { %v3788_v63 = vpack.c.bf16 %v3603_v61, %v2231_v62 }
 0x8d0   : > { %3790 = vmatprep.subr.msk.bf16.mxu1 %vm4278_vm12, %v3788_v63 }
 0x8d5   : > { %3793 = vmatpush3.bf16.xpose.msk.msra.mxu1 %vm4278_vm12, %v3788_v63 }
 0x8d6   : > { %3651 = vmatprep.subr.mxu1 %v4002_v6 }
 0x91f   : > { %v2055_v0 = vpop.permute.xlu1 %2054  ;;  %v2052_v1 = vpop.permute.xlu0 %2051 }
 0x920   : > { %v3758_v2 = vpack.c.bf16 %v2052_v1, %v1963_v54 }
 0x922   : > { %3759 = vmatprep.subr.bf16.mxu0 %v3758_v2 }
 0x923   : > { %v3890_v4 = vpop.permute.xlu1 %3889  ;;  %3761 = vmatpush3.bf16.msra.mxu0 %v3758_v2  ;;  %v2058_v5 = vpop.permute.xlu0 %2057 }
 0x924   : > { %v3892_v7 = vunpack.i.h.bf16 %v3890_v4  ;;  %v3891_v9 = vunpack.i.l.bf16 %v3890_v4  ;;  %v3762_v10 = vpack.c.bf16 %v2058_v5, %v2055_v0 }
 0x926   : > { %v3774_v8 = vpack.c.bf16 %v3892_v7, %v3891_v9  ;;  %3763 = vmatprep.subr.bf16.mxu0 %v3762_v10  ;;  %v2591_v7 = vld [vmem:[%s4656_s11] sm:$0xff] }
 0x927   : > { %3765 = vmatpush3.bf16.msra.mxu0 %v3762_v10  ;;  %v3895_v11 = vpop.permute.xlu0 %3894 }
 0x928   : > { %3775 = vmatprep.subr.bf16.mxu0 %v3774_v8  ;;  %v3897_v12 = vunpack.i.h.bf16 %v3895_v11  ;;  %v3896_v17 = vunpack.i.l.bf16 %v3895_v11 }
 0x92a   : > { %3585 = vmatmul.mubr.msk.f32.vlgmr.msra.gmra.mrb[20].mxu0 %vm680_vm1, %v4224_v40  ;;  %v3778_v13 = vpack.c.bf16 %v3897_v12, %v3896_v17  ;;  %v2594_v12 = vld [vmem:[%s4656_s11 + $0x18] sm:$0xff] }
 0x92b   : > { %3777 = vmatpush3.bf16.msra.mxu0 %v3774_v8  ;;  %3587 = vmatprep.mubr.msk.f32.mxu0 %vm680_vm1, %v4227_v41 }
 0x92c   : > { %3779 = vmatprep.subr.bf16.mxu0 %v3778_v13 }
 0x92e   : > { %3588 = vmatmul.mubr.msk.f32.gmra.mrb[22].mxu0 %vm680_vm1, %v4234_v42 }
 0x92f   : > { %3781 = vmatpush3.bf16.msra.mxu0 %v3778_v13  ;;  %3612 = vmatprep.mubr.msk.f32.mxu0 %vm680_vm1, %v4212_v27  ;;  %v2593_v13 = vld [vmem:[%s4656_s11 + $0x10] sm:$0xff] }
 0x932   : > { %3613 = vmatmul.mubr.msk.f32.vlgmr.msra.gmra.mrb[24].mxu0 %vm680_vm1, %v4224_v40 }
 0x933   : > { %3615 = vmatprep.mubr.msk.f32.mxu0 %vm680_vm1, %v4227_v41 }
 0x936   : > { %3616 = vmatmul.mubr.msk.f32.gmra.mrb[26].mxu0 %vm680_vm1, %v4234_v42 }
 0x9fd   : > { %v3586_v16 = vpop.f32.mrb[20].mxu0 }
 0x9fe   : > { %v2126_v19 = vpop.f32.mrb[21].mxu0 }
 0x9ff   : > { %3626 = vmatprep.mubr.msk.f32.mxu1 %vm1055_vm7, %v2126_v19 }
 0xa00   : > { %3627 = vmatmul.mubr.msk.f32.vlgmr.msra.gmra.mrb[26].mxu1 %vm1055_vm7, %v3586_v16 }
 0xa01   : > { %v3589_v22 = vpop.f32.mrb[22].mxu0  ;;  %3652 = vmatpush3.msra.mxu1 %v2592_v60 }
 0xa02   : > { %v2136_v23 = vpop.f32.mrb[23].mxu0  ;;  %3661 = vmatprep.subr.mxu1 %v4002_v6 }
 0xa03   : > { %3629 = vmatprep.mubr.msk.f32.mxu1 %vm1055_vm7, %v2136_v23  ;;  %v3290_v23 = vld [vmem:[%s4657_s12] ss:$0 sm:$0xff] }
 0xa04   : > { %3630 = vmatmul.mubr.msk.f32.gmra.mrb[28].mxu1 %vm1055_vm7, %v3589_v22 }
 0xa05   : > { %3653 = vmatprep.mubr.msk.f32.mxu1 %vm4001_vm0, %v4002_v6  ;;  %v3614_v54 = vpop.f32.mrb[24].mxu0 }
 0xa06   : > { %v2318_v55 = vpop.f32.mrb[25].mxu0 }
 0xa07   : > { %v3794_v56 = vpack.c.bf16 %v3614_v54, %v2318_v55 }
 0xa09   : > { %v3617_v57 = vpop.f32.mrb[26].mxu0  ;;  %3795 = vmatprep.subr.bf16.mxu0 %v3794_v56 }
 0xa0a   : > { %v2328_v58 = vpop.f32.mrb[27].mxu0  ;;  %3797 = vmatpush3.bf16.msra.mxu0 %v3794_v56 }
 0xa0b   : > { %v3798_v59 = vpack.c.bf16 %v3617_v57, %v2328_v58 }
 0xa0d   : > { %3799 = vmatprep.subr.bf16.mxu0 %v3798_v59 }
 0xa0e   : > { %3801 = vmatpush3.bf16.msra.mxu0 %v3798_v59 }
 0xa0f   : > { %3646 = vmatprep.subr.mxu0 %v4002_v6 }
 0xad3   : > { %v3628_v27 = vpop.f32.mrb[26].mxu1 }
 0xad4   : > { %v2447_v40 = vsel %vm1398_vm13, %v3628_v27, -1e+30  ;;  %v2427_v41 = vpop.f32.mrb[27].mxu1 }
 0xad5   : > { %v2446_v42 = vsel %vm1397_vm15, %v2427_v41, -1e+30  ;;  %v2453_v24 = vsel %vm680_vm1, %v2447_v40, -inf }
 0xad6   : > { %2454 = vmax.xlane.f32.xlu0 %v2453_v24  ;;  %v2450_v25 = vsel %vm680_vm1, %v2446_v42, -inf }
 0xad7   : > { %2451 = vmax.xlane.f32.xlu1 %v2450_v25  ;;  %v3631_v26 = vpop.f32.mrb[28].mxu1 }
 0xad8   : > { %v2449_v28 = vsel %vm1400_vm3, %v3631_v26, -1e+30  ;;  %v2437_v29 = vpop.f32.mrb[29].mxu1 }
 0xad9   : > { %v2448_v43 = vsel %vm1399_vm5, %v2437_v29, -1e+30  ;;  %v2459_v30 = vsel %vm680_vm1, %v2449_v28, -inf }
 0xada   : > { %v2456_v47 = vsel %vm680_vm1, %v2448_v43, -inf }
 0xadb   : > { %2460 = vmax.xlane.f32.xlu1 %v2459_v30  ;;  %2457 = vmax.xlane.f32.xlu0 %v2456_v47 }
 0xb63   : > { %v2455_v31 = vpop.xlane.xlu0 %2454 }
 0xb64   : > { %v2463_v32 = vsub.f32 %v2447_v40, %v2455_v31  ;;  %v2452_v33 = vpop.xlane.xlu1 %2451 }
 0xb65   : > { %v2462_v34 = vsub.f32 %v2446_v42, %v2452_v33 }
 0xb66   : > { %v2468_v35 = vmul.f32 1.442695, %v2463_v32 }
 0xb67   : > { %v2466_v36 = vmul.f32 1.442695, %v2462_v34 }
 0xb68   : > { %3916 = vpow2.f32 %v2468_v35  ;;  %v2461_v15 = vpop.xlane.xlu1 %2460  ;;  %v2458_v37 = vpop.xlane.xlu0 %2457 }
 0xb69   : > { %3918 = vpow2.f32 %v2466_v36  ;;  %v2465_v38 = vsub.f32 %v2449_v28, %v2461_v15  ;;  %v2464_v45 = vsub.f32 %v2448_v43, %v2458_v37  ;;  %v2914_v15 = vld [vmem:[%s4660_s15] sm:$0xff]  ;;  %v2915_v37 = vld [vmem:[%s4660_s15 + $0x8] sm:$0xff] }
 0xb6b   : > { %v2472_v44 = vmul.f32 1.442695, %v2465_v38  ;;  %v2470_v50 = vmul.f32 1.442695, %v2464_v45  ;;  %v3803_v38 = vpack.c.bf16 %v2915_v37, %v2914_v15  ;;  %v2917_v45 = vld [vmem:[%s4660_s15 + $0x18] sm:$0xff] }
 0xb6d   : > { %3920 = vpow2.f32 %v2472_v44 }
 0xb6e   : > { %3922 = vpow2.f32 %v2470_v50  ;;  %v2999_v50 = vld [vmem:[%s4662_s17] sm:$0xff] }
 0xb72   : > { %v3917_v48 = vpop.eup %3916 }
 0xb73   : > { %v3919_v14 = vpop.eup %3918  ;;  %v2477_v18 = vsel %vm680_vm1, %v3917_v48, 0.0 }
 0xb74   : > { %2478 = vadd.xlane.f32.xlu1 %v2477_v18  ;;  %v2474_v21 = vsel %vm680_vm1, %v3919_v14, 0.0 }
 0xb75   : > { %2475 = vadd.xlane.f32.xlu0 %v2474_v21  ;;  %v3002_v21 = vld [vmem:[%s4662_s17 + $0x18] sm:$0xff] }
 0xb77   : > { %v3921_v51 = vpop.eup %3920 }
 0xb78   : > { %v3923_v52 = vpop.eup %3922  ;;  %v2483_v20 = vsel %vm680_vm1, %v3921_v51, 0.0 }
 0xb79   : > { %2484 = vadd.xlane.f32.xlu1 %v2483_v20  ;;  %v2480_v53 = vsel %vm680_vm1, %v3923_v52, 0.0  ;;  %v3004_v20 = vld [vmem:[%s4662_s17 + $0x28] sm:$0xff] }
 0xb7a   : > { %2481 = vadd.xlane.f32.xlu0 %v2480_v53 }
 0xc01   : > { %v2479_v61 = vpop.xlane.xlu1 %2478 }
 0xc02   : > { %3924 = vrcp.f32 %v2479_v61  ;;  %v2476_v62 = vpop.xlane.xlu0 %2475  ;;  %v3005_v61 = vld [vmem:[%s4662_s17 + $0x30] sm:$0xff] }
 0xc03   : > { %3926 = vrcp.f32 %v2476_v62 }
 0xc06   : > { %v2485_v63 = vpop.xlane.xlu1 %2484 }
 0xc07   : > { %3928 = vrcp.f32 %v2485_v63  ;;  %v2482_v0 = vpop.xlane.xlu0 %2481  ;;  %v3294_v63 = vld [vmem:[%s4661_s16] ss:$0 sm:$0xff] }
 0xc08   : > { %3930 = vrcp.f32 %v2482_v0 }
 0xc0c   : > { %v3925_v1 = vpop.eup %3924 }
 0xc0d   : > { %v3927_v2 = vpop.eup %3926  ;;  %v2491_v5 = vmul.f32 %v3925_v1, %v3917_v48  ;;  %v3000_v48 = vld [vmem:[%s4662_s17 + $0x8] sm:$0xff] }
 0xc0e   : > { %v2490_v4 = vmul.f32 %v3927_v2, %v3919_v14  ;;  %v3001_v14 = vld [vmem:[%s4662_s17 + $0x10] sm:$0xff]  ;;  %v3809_v18 = vpack.c.bf16 %v3000_v48, %v2999_v50 }
 0xc10   : > { %3640 = vmatprep.mubr.msk.f32.mxu0 %vm680_vm1, %v2490_v4 }
 0xc11   : > { %v3929_v9 = vpop.eup %3928  ;;  %3641 = vmatmul.mubr.msk.f32.vlgmr.msra.gmra.mrb[28].mxu0 %vm680_vm1, %v2491_v5  ;;  %v3296_v5 = vld [vmem:[%s4663_s18] ss:$0 sm:$0xff] }
 0xc12   : > { %v3931_v10 = vpop.eup %3930  ;;  %v2493_v8 = vmul.f32 %v3929_v9, %v3921_v51  ;;  %3647 = vmatpush3.msra.mxu0 %v2591_v7  ;;  %v3812_v51 = vpack.c.bf16 %v3002_v21, %v3001_v14 }
 0xc13   : > { %v2492_v11 = vmul.f32 %v3931_v10, %v3923_v52  ;;  %3656 = vmatprep.subr.mxu0 %v4002_v6  ;;  %v3003_v52 = vld [vmem:[%s4662_s17 + $0x20] sm:$0xff] }
 0xc14   : > { %v3815_v53 = vpack.c.bf16 %v3004_v20, %v3003_v52 }
 0xc15   : > { %3643 = vmatprep.mubr.msk.f32.mxu0 %vm680_vm1, %v2492_v11 }
 0xc16   : > { %3644 = vmatmul.mubr.msk.f32.gmra.mrb[30].mxu0 %vm680_vm1, %v2493_v8 }
 0xc17   : > { %3648 = vmatprep.mubr.msk.f32.mxu0 %vm4001_vm0, %v4002_v6 }
 0xce4   : > { %v3642_v17 = vpop.f32.mrb[28].mxu0 }
 0xce5   : > { %v2572_v16 = vpop.f32.mrb[29].mxu0  ;;  %3654 = vmatmul.mubr.msk.f32.vlgmr.msra.gmra.mrb[30].mxu1 %vm1055_vm7, %v3642_v17 }
 0xce6   : > { %3649 = vmatmul.mubr.msk.f32.vlgmr.msra.gmra.mrb[32].mxu0 %vm1055_vm7, %v2572_v16  ;;  %3662 = vmatpush3.msra.mxu1 %v2594_v12 }
 0xce7   : > { %3657 = vmatpush3.msra.mxu0 %v2593_v13  ;;  %3663 = vmatprep.mubr.msk.f32.mxu1 %vm4001_vm0, %v4002_v6 }
 0xce8   : > { %3658 = vmatprep.mubr.msk.f32.mxu0 %vm4001_vm0, %v4002_v6  ;;  %3802 = vmatprep.subr.bf16.mxu0 %v4000_v3 }
 0xce9   : > { %v3645_v19 = vpop.f32.mrb[30].mxu0  ;;  %3808 = vmatprep.subr.bf16.mxu1 %v4000_v3 }
 0xcea   : > { %v2582_v22 = vpop.f32.mrb[31].mxu0  ;;  %3664 = vmatmul.mubr.msk.f32.vlgmr.msra.gmra.mrb[32].mxu1 %vm1055_vm7, %v3645_v19 }
 0xceb   : > { %3659 = vmatmul.mubr.msk.f32.vlgmr.msra.gmra.mrb[34].mxu0 %vm1055_vm7, %v2582_v22  ;;  %3693 = vmatprep.mubr.msk.f32.mxu1 %vm4001_vm0, %v4002_v6 }
 0xcec   : > { %3674 = vmatprep.mubr.msk.f32.mxu0 %vm4001_vm0, %v4002_v6  ;;  %3804 = vmatpush3.bf16.msra.mxu0 %v3803_v38  ;;  %vm3014_vm0 = vcmask 523264  }
 0xced   : > { %3805 = vmatprep.subr.bf16.mxu0 %v4000_v3  ;;  %3810 = vmatpush3.bf16.msra.mxu1 %v3809_v18 }
 0xcee   : > { %3811 = vmatprep.subr.bf16.mxu1 %v4000_v3 }
 0xcf1   : > { %3813 = vmatpush3.bf16.msra.mxu1 %v3812_v51 }
 0xcf2   : > { %3814 = vmatprep.subr.bf16.mxu1 %v4000_v3 }
 0xcf5   : > { %3816 = vmatpush3.bf16.msra.mxu1 %v3815_v53 }
 0xcf6   : > { %3817 = vmatprep.subr.bf16.mxu1 %v4000_v3  ;;  %v3006_v3 = vld [vmem:[%s4662_s17 + $0x38] sm:$0xff] }
 0xcf7   : > { %v3818_v62 = vpack.c.bf16 %v3006_v3, %v3005_v61 }
 0xcf9   : > { %3819 = vmatpush3.bf16.msra.mxu1 %v3818_v62 }
 0xdb8   : > { %v2745_v27 = vpop.f32.mrb[30].mxu1 }
 0xdb9   : > { %v2665_v40 = vpop.f32.mrb[32].mxu0  ;;  %v3655_v41 = vpop.f32.mrb[31].mxu1 }
 0xdba   : > { %v2675_v42 = vadd.f32 %v3290_v23, %v2665_v40  ;;  %v3650_v24 = vpop.f32.mrb[33].mxu0 }
 0xdbc   : > { %v2749_v25 = vadd.f32 %v2745_v27, %v2675_v42 }
 0xdbd   : > { %v2893_v26 = vpop.f32.mrb[32].mxu1 }
 0xdbe   : > { %v2819_v28 = vpop.f32.mrb[34].mxu0  ;;  %v3665_v29 = vpop.f32.mrb[33].mxu1 }
 0xdbf   : > { %v2823_v43 = vadd.f32 %v2819_v28, %v2749_v25  ;;  %v3660_v30 = vpop.f32.mrb[35].mxu0 }
 0xdc1   : > { %v2897_v47 = vadd.f32 %v2893_v26, %v2823_v43 }
 0xdc3   : > { %v2898_v31 = vadd.f32 %v2897_v47, %v4434_v49  ;;  %v2916_v49 = vld [vmem:[%s4660_s15 + $0x10] sm:$0xff] }
 0xdc4   : > { %v3806_v44 = vpack.c.bf16 %v2917_v45, %v2916_v49 }
 0xdc5   : > { %v2899_v6 = vsel %vm680_vm1, %v2898_v31, 0.0 }
 0xdc6   : > { %2900 = vadd.xlane.f32.xlu0 %v2899_v6  ;;  %3807 = vmatpush3.bf16.msra.mxu0 %v3806_v44 }
 0xe53   : > { %v2901_v32 = vpop.xlane.xlu0 %2900 }
 0xe54   : > { %v2902_v33 = vmul.f32 0.03125, %v2901_v32 }
 0xe56   : > { %v2903_v34 = vsub.f32 %v2898_v31, %v2902_v33 }
 0xe58   : > { %v2904_v35 = vmul.f32 %v2903_v34, %v2903_v34 }
 0xe5a   : > { %v2905_v36 = vsel %vm680_vm1, %v2904_v35, 0.0 }
 0xe5b   : > { %2906 = vadd.xlane.f32.xlu1 %v2905_v36 }
 0xee8   : > { %v2907_v54 = vpop.xlane.xlu1 %2906 }
 0xee9   : > { %v2908_v55 = vmul.f32 0.03125, %v2907_v54 }
 0xeeb   : > { %v2909_v56 = vadd.f32 1e-05, %v2908_v55 }
 0xeed   : > { %3932 = vrsqrt.f32 %v2909_v56 }
 0xef7   : > { %v3933_v57 = vpop.eup %3932 }
 0xef8   : > { %v2911_v58 = vmul.f32 %v3933_v57, %v2903_v34 }
 0xefa   : > { %v2912_v59 = vmul.f32 %v4425_v39, %v2911_v58 }
 0xefc   : > { %v2913_v60 = vadd.f32 %v4430_v46, %v2912_v59 }
 0xefe   : > { %3675 = vmatmul.mubr.msk.f32.vlgmr.msra.gmra.mrb[36].mxu0 %vm680_vm1, %v2913_v60 }
 0xfd1   : > { %v2994_v0 = vpop.f32.mrb[36].mxu0 }
 0xfd2   : > { %v2995_v1 = vadd.f32 %v3294_v63, %v2994_v0  ;;  %v3676_v2 = vpop.f32.mrb[37].mxu0 }
 0xfd4   : > { %v2998_v4 = vmax.f32 %v2995_v1, 0.0 }
 0xfd6   : > { %3694 = vmatmul.mubr.msk.f32.vlgmr.msra.gmra.mrb[34].mxu1 %vm3014_vm0, %v2998_v4 }
0x10a9   : > { %v3084_v7 = vpop.f32.mrb[34].mxu1 }
0x10aa   : > { %v3085_v9 = vadd.f32 %v3296_v5, %v3084_v7  ;;  %v3695_v10 = vpop.f32.mrb[35].mxu1 }
0x10ac   : > { %v3088_v8 = vadd.f32 %v3085_v9, %v2913_v60 }
0x10ae   : > { %v3089_v11 = vsel %vm680_vm1, %v3088_v8, 0.0 }
0x10af   : > { %3090 = vadd.xlane.f32.xlu0 %v3089_v11 }
0x113c   : > { %v3091_v12 = vpop.xlane.xlu0 %3090 }
0x113d   : > { %v3092_v17 = vmul.f32 0.03125, %v3091_v12 }
0x113f   : > { %v3093_v13 = vsub.f32 %v3088_v8, %v3092_v17 }
0x1141   : > { %v3094_v16 = vmul.f32 %v3093_v13, %v3093_v13 }
0x1143   : > { %v3095_v19 = vsel %vm680_vm1, %v3094_v16, 0.0 }
0x1144   : > { %3096 = vadd.xlane.f32.xlu1 %v3095_v19 }
0x11d1   : > { %v3097_v22 = vpop.xlane.xlu1 %3096 }
0x11d2   : > { %v3098_v23 = vmul.f32 0.03125, %v3097_v22 }
0x11d4   : > { %v3099_v27 = vadd.f32 1e-05, %v3098_v23 }
0x11d6   : > { %3934 = vrsqrt.f32 %v3099_v27 }
0x11e0   : > { %v3935_v40 = vpop.eup %3934 }
0x11e1   : > { %v3101_v41 = vmul.f32 %v3935_v40, %v3093_v13 }
0x11e3   : > { %v3102_v42 = vmul.f32 %v4425_v39, %v3101_v41 }
0x11e5   : > { %v3103_v24 = vadd.f32 %v4430_v46, %v3102_v42 }
0x11e7   : > { %3104 = vst.msk [vmem:[%s619_s22] sm:$0xff] %vm680_vm1, %v3103_v24 }
0x11e8   : > { %3949 = shalt.err (!%p3946_p3)
}
0x11e9   : > { %s3950_s25 = scalar_lea.hbm %s4602_s23, 128  ;;  %s3954_s20 = scalar_lea.hbm %s4664_s19, 256 }
0x11ea   : > { %p3951_p4 = scmp.ne.s32.totalorder %s4602_s23, %s3950_s25  ;;  %p3955_p9 = scmp.lt.u32.totalorder %s4602_s23, %s4664_s19 }
0x11eb   : > { %p3956_p10 = scmp.lt.u32.totalorder %s3954_s20, %s3950_s25  ;;  %p3958_p12 = scmp.lt.u32.totalorder %s3950_s25, %s4602_s23 }
0x11ec   : > { %p3952_p7 = pnand %p3951_p4, %p4148_p5 }
0x11ed   : > { %p3957_p11 = por %p3956_p10, %p3955_p9 }
0x11ee   : > { %p3953_p8 = pneg %p3952_p7 }
0x11ef   : > { %p3959_p13 = por %p3958_p12, %p3957_p11 }
0x11f1   : > { %p3960_p0 = pnand %p3959_p13, %p3953_p8 }
0x11f3   : > { %3963 = shalt.err (!%p3960_p0)
}
0x11f4   : > { %3820 = dma.vmem_to_hbm [thread:$0]  (%p4148_p5), %s4604_s24, 128, %s4602_s23, %s3106_s29  }
0x11f5 PF: > { %p3826_p1 = scmp.ge.s32.totalorder %s3998_s21, 2  ;;  %s3131_s1 = sand.u32 1, %s3986_s0  }
0x11f6   : > { %s3132_s4 = scalar_lea.sflag [#allocation3], %s3131_s1 }
0x11f7   : > { %p3823_p2 = pnand %p3826_p1, %p4152_p6 }
0x11f9   : > { %3981 = dma.done.wait (!%p3823_p2), %s3132_s4, 128  }
0x11fa   : > { %3983 = vsyncadd (!%p3823_p2), %s3132_s4, 4294967168  ;;  %s4701_s21 = sld [smem:[#allocation6_spill]]  ;;  %s4702_s5 = sld [smem:[#allocation5_spill]] }
0x11fb   : > { %s4703_s20 = sld [smem:[#allocation7_spill]]  ;;  %s4704_s0 = smov %s3990_s30 }
0x1200   : > { %p29_p3 = scmp.ge.s32.totalorder %s4701_s21, 4   ;;  %s4705_s30 = smov %s4702_s5 }
0x1202   :  { %31 = sbr.rel (!%p29_p3) target bundleno = 10 (0xa), region = 137 }
0x1209   :  { %3137 = vsyncpa [#allocation3], 1 }
0x120a   :  { %3139 = vsyncpa [#allocation3 + $0x1], 1 }

</bundles_post_ra>
